<compile_context>
chip_gen: v7x
topology: tpu7x:2x2x1
jax: 0.10.0
libtpu: 0.0.40
codegen_flags: <defaults>
</compile_context>

<pallas_src>
import functools

import jax
import jax.numpy as jnp
from jax.experimental import pallas as pl
from jax.experimental.pallas import tpu as pltpu


# ---------------------------------------------------------------------------
# Pallas kernel: split-first-layer MLP (Linear->LReLU x3 -> Linear -> Softmax)
# ---------------------------------------------------------------------------
def _inverse_model_kernel(s_ref, ns_ref,
                          w1a_ref, w1b_ref, b1_ref,
                          w2_ref, b2_ref,
                          w3_ref, b3_ref,
                          w4_ref, b4_ref,
                          out_ref):
    def lrelu(v):
        # torch.nn.LeakyReLU default negative_slope = 0.01 (f32 on the VPU)
        return jnp.where(v > 0, v, 0.01 * v)

    # First layer: concat(s, ns) @ W1 == s @ W1[:F] + ns @ W1[F:]  (no concat).
    s = s_ref[...].astype(jnp.bfloat16)
    ns = ns_ref[...].astype(jnp.bfloat16)
    h = (jnp.dot(s, w1a_ref[...], preferred_element_type=jnp.float32)
         + jnp.dot(ns, w1b_ref[...], preferred_element_type=jnp.float32)
         + b1_ref[...])
    h = lrelu(h)

    h = jnp.dot(h.astype(jnp.bfloat16), w2_ref[...],
                preferred_element_type=jnp.float32) + b2_ref[...]
    h = lrelu(h)

    h = jnp.dot(h.astype(jnp.bfloat16), w3_ref[...],
                preferred_element_type=jnp.float32) + b3_ref[...]
    h = lrelu(h)

    logits = jnp.dot(h.astype(jnp.bfloat16), w4_ref[...],
                     preferred_element_type=jnp.float32) + b4_ref[...]

    # Softmax over dim=1 (action axis); reciprocal goes to the EUP slot.
    m = jnp.max(logits, axis=-1, keepdims=True)
    e = jnp.exp(logits - m)
    denom = jnp.sum(e, axis=-1, keepdims=True)
    out_ref[...] = (e * pl.reciprocal(denom, approx=True)).astype(out_ref.dtype)


def _resident_spec(shape):
    """Full-array block whose index_map is constant -> stays pinned in VMEM."""
    return pl.BlockSpec(shape, lambda i: (0, 0))


@functools.partial(jax.jit, static_argnames=("tb",))
def inverse_model_forward(state_features, new_state_features, params, *, tb=None):
    """Pallas implementation of InverseModel.forward.

    state_features, new_state_features: (B, F) each; torch module concatenates
    them along dim=1 before the first Linear. Here the first matmul is split
    instead (mathematically identical).
    """
    B, F = state_features.shape
    action_size = params["w4"].shape[1]

    if tb is None:
        # Batch tile: big enough to feed the MXU for real batches, whole batch
        # (== full array dim, always layout-legal) for small ones.
        tb = 256 if B >= 256 else B
    grid = (pl.cdiv(B, tb),)

    args = (state_features, new_state_features,
            params["w1a"], params["w1b"], params["b1"],
            params["w2"], params["b2"],
            params["w3"], params["b3"],
            params["w4"], params["b4"])

    in_specs = [
        pl.BlockSpec((tb, F), lambda i: (i, 0)),   # state tile (streams)
        pl.BlockSpec((tb, F), lambda i: (i, 0)),   # new-state tile (streams)
    ] + [_resident_spec(a.shape) for a in args[2:]]  # weights/biases pinned

    out_specs = pl.BlockSpec((tb, action_size), lambda i: (i, 0))

    return pl.pallas_call(
        _inverse_model_kernel,
        out_shape=jax.ShapeDtypeStruct((B, action_size), jnp.float32),
        grid=grid,
        in_specs=in_specs,
        out_specs=out_specs,
        compiler_params=pltpu.CompilerParams(
            dimension_semantics=("parallel",),      # 2 TCs on v7x; no-op v5e/v6e
            vmem_limit_bytes=48 * 1024 * 1024,
        ),
    )(*args)


# ---------------------------------------------------------------------------
# Deterministic parameter construction (xavier_uniform weights, torch-default
# uniform(-1/sqrt(fan_in), 1/sqrt(fan_in)) biases). Weights stored as (in, out)
# in bf16 (halves weight DMA, feeds the bf16 MXU); biases kept in f32.
# ---------------------------------------------------------------------------
def _xavier_uniform(key, fan_in, fan_out):
    bound = jnp.sqrt(6.0 / (fan_in + fan_out))
    w = jax.random.uniform(key, (fan_in, fan_out), jnp.float32, -bound, bound)
    return w.astype(jnp.bfloat16)


def _bias(key, fan_in, fan_out):
    bound = 1.0 / jnp.sqrt(fan_in)
    return jax.random.uniform(key, (1, fan_out), jnp.float32, -bound, bound)


def make_params(key, f_layer_size, action_size):
    ks = jax.random.split(key, 8)
    dims = [(f_layer_size, 256), (256, 512), (512, 512), (512, action_size)]
    params = {}
    for i, (fi, fo) in enumerate(dims, start=1):
        params[f"w{i}"] = _xavier_uniform(ks[2 * (i - 1)], fi, fo)
        params[f"b{i}"] = _bias(ks[2 * (i - 1) + 1], fi, fo)
    # Pre-split W1 so the kernel never needs the concatenated input.
    half = f_layer_size // 2
    params["w1a"] = params["w1"][:half]
    params["w1b"] = params["w1"][half:]
    del params["w1"]
    return params


# ---------------------------------------------------------------------------
# Pure-JAX f32 reference for verification (same bf16 weight values, f32 math).
# ---------------------------------------------------------------------------
def reference_forward(state_features, new_state_features, params):
    def lrelu(v):
        return jnp.where(v > 0, v, 0.01 * v)

    f32 = lambda a: a.astype(jnp.float32)
    h = lrelu(state_features @ f32(params["w1a"])
              + new_state_features @ f32(params["w1b"]) + params["b1"])
    h = lrelu(h @ f32(params["w2"]) + params["b2"])
    h = lrelu(h @ f32(params["w3"]) + params["b3"])
    logits = h @ f32(params["w4"]) + params["b4"]
    return jax.nn.softmax(logits, axis=1)


if __name__ == "__main__":
    key = jax.random.PRNGKey(0)
    k_s, k_ns, k_p = jax.random.split(key, 3)

    batch = 64
    feat = 32                      # each feature vector
    f_layer_size = 2 * feat        # concat along dim=1 in the torch module
    action_size = 4

    state_features = jax.random.normal(k_s, (batch, feat), jnp.float32)
    new_state_features = jax.random.normal(k_ns, (batch, feat), jnp.float32)
    params = make_params(k_p, f_layer_size, action_size)

    # tb=32 -> 2 grid steps: exercises batch tiling + VMEM-resident weights.
    out = inverse_model_forward(state_features, new_state_features, params, tb=32)
    out = jax.block_until_ready(out)

    ref = reference_forward(state_features, new_state_features, params)
    assert out.shape == (batch, action_size)
    # bf16 matmul operands + approx reciprocal -> relaxed tolerance vs f32 ref.
    assert jnp.allclose(out, ref, atol=2e-2, rtol=2e-2)
    row_sums = jnp.sum(out, axis=1)
    assert jnp.allclose(row_sums, jnp.ones_like(row_sums), atol=1e-2)

    print("KERNEL_OK")
</pallas_src>

<mosaic_0001>
module attributes {stable_mosaic.version = 11 : i64} {
  func.func @_inverse_model_kernel(%arg0: i32, %arg1: memref<32x32xf32, #tpu.memory_space<vmem>>, %arg2: memref<32x32xf32, #tpu.memory_space<vmem>>, %arg3: memref<32x256xbf16, #tpu.memory_space<vmem>>, %arg4: memref<32x256xbf16, #tpu.memory_space<vmem>>, %arg5: memref<1x256xf32, #tpu.memory_space<vmem>>, %arg6: memref<256x512xbf16, #tpu.memory_space<vmem>>, %arg7: memref<1x512xf32, #tpu.memory_space<vmem>>, %arg8: memref<512x512xbf16, #tpu.memory_space<vmem>>, %arg9: memref<1x512xf32, #tpu.memory_space<vmem>>, %arg10: memref<512x4xbf16, #tpu.memory_space<vmem>>, %arg11: memref<1x4xf32, #tpu.memory_space<vmem>>, %arg12: memref<32x4xf32, #tpu.memory_space<vmem>>) attributes {dimension_semantics = [#tpu.dimension_semantics<parallel>], iteration_bounds = array<i64: 2>, scalar_prefetch = 0 : i64, scratch_operands = 0 : i64, tpu.core_type = #tpu.core_type<tc>, window_params = [{transform_indices = @transform_0, window_bounds = array<i64: 32, 32>}, {transform_indices = @transform_1, window_bounds = array<i64: 32, 32>}, {pipeline_mode = #tpu.pipeline_mode<synchronous>, transform_indices = @transform_2, window_bounds = array<i64: 32, 256>}, {pipeline_mode = #tpu.pipeline_mode<synchronous>, transform_indices = @transform_3, window_bounds = array<i64: 32, 256>}, {pipeline_mode = #tpu.pipeline_mode<synchronous>, transform_indices = @transform_4, window_bounds = array<i64: 1, 256>}, {pipeline_mode = #tpu.pipeline_mode<synchronous>, transform_indices = @transform_5, window_bounds = array<i64: 256, 512>}, {pipeline_mode = #tpu.pipeline_mode<synchronous>, transform_indices = @transform_6, window_bounds = array<i64: 1, 512>}, {pipeline_mode = #tpu.pipeline_mode<synchronous>, transform_indices = @transform_7, window_bounds = array<i64: 512, 512>}, {pipeline_mode = #tpu.pipeline_mode<synchronous>, transform_indices = @transform_8, window_bounds = array<i64: 1, 512>}, {pipeline_mode = #tpu.pipeline_mode<synchronous>, transform_indices = @transform_9, window_bounds = array<i64: 512, 4>}, {pipeline_mode = #tpu.pipeline_mode<synchronous>, transform_indices = @transform_10, window_bounds = array<i64: 1, 4>}, {transform_indices = @transform_11, window_bounds = array<i64: 32, 4>}]} {
    %c0 = arith.constant 0 : index
    %c0_0 = arith.constant 0 : index
    %0 = vector.load %arg1[%c0, %c0_0] : memref<32x32xf32, #tpu.memory_space<vmem>>, vector<32x32xf32>
    %1 = arith.truncf %0 : vector<32x32xf32> to vector<32x32xbf16>
    %c0_1 = arith.constant 0 : index
    %c0_2 = arith.constant 0 : index
    %2 = vector.load %arg2[%c0_1, %c0_2] : memref<32x32xf32, #tpu.memory_space<vmem>>, vector<32x32xf32>
    %3 = arith.truncf %2 : vector<32x32xf32> to vector<32x32xbf16>
    %c0_3 = arith.constant 0 : index
    %c0_4 = arith.constant 0 : index
    %4 = vector.load %arg3[%c0_3, %c0_4] : memref<32x256xbf16, #tpu.memory_space<vmem>>, vector<32x256xbf16>
    %cst = arith.constant dense<0.000000e+00> : vector<32x256xf32>
    %5 = tpu.matmul %1, %4, %cst {dimension_numbers = #tpu.dot_dimension_numbers<[1], [0], [0], [1], [0, 0, 1, 1], [], []>} : vector<32x32xbf16>, vector<32x256xbf16>, vector<32x256xf32> -> vector<32x256xf32>
    %c0_5 = arith.constant 0 : index
    %c0_6 = arith.constant 0 : index
    %6 = vector.load %arg4[%c0_5, %c0_6] : memref<32x256xbf16, #tpu.memory_space<vmem>>, vector<32x256xbf16>
    %cst_7 = arith.constant dense<0.000000e+00> : vector<32x256xf32>
    %7 = tpu.matmul %3, %6, %cst_7 {dimension_numbers = #tpu.dot_dimension_numbers<[1], [0], [0], [1], [0, 0, 1, 1], [], []>} : vector<32x32xbf16>, vector<32x256xbf16>, vector<32x256xf32> -> vector<32x256xf32>
    %8 = arith.addf %5, %7 : vector<32x256xf32>
    %c0_8 = arith.constant 0 : index
    %c0_9 = arith.constant 0 : index
    %9 = vector.load %arg5[%c0_8, %c0_9] : memref<1x256xf32, #tpu.memory_space<vmem>>, vector<1x256xf32>
    %10 = vector.broadcast %9 : vector<1x256xf32> to vector<32x256xf32>
    %11 = arith.addf %8, %10 : vector<32x256xf32>
    %cst_10 = arith.constant 0.000000e+00 : f32
    %12 = vector.broadcast %cst_10 : f32 to vector<32x256xf32>
    %13 = arith.cmpf ogt, %11, %12 : vector<32x256xf32>
    %cst_11 = arith.constant 0.00999999977 : f32
    %14 = vector.broadcast %cst_11 : f32 to vector<32x256xf32>
    %15 = arith.mulf %14, %11 : vector<32x256xf32>
    %16 = arith.select %13, %11, %15 : vector<32x256xi1>, vector<32x256xf32>
    %17 = arith.truncf %16 : vector<32x256xf32> to vector<32x256xbf16>
    %c0_12 = arith.constant 0 : index
    %c0_13 = arith.constant 0 : index
    %18 = vector.load %arg6[%c0_12, %c0_13] : memref<256x512xbf16, #tpu.memory_space<vmem>>, vector<256x512xbf16>
    %cst_14 = arith.constant dense<0.000000e+00> : vector<32x512xf32>
    %19 = tpu.matmul %17, %18, %cst_14 {dimension_numbers = #tpu.dot_dimension_numbers<[1], [0], [0], [1], [0, 0, 1, 1], [], []>} : vector<32x256xbf16>, vector<256x512xbf16>, vector<32x512xf32> -> vector<32x512xf32>
    %c0_15 = arith.constant 0 : index
    %c0_16 = arith.constant 0 : index
    %20 = vector.load %arg7[%c0_15, %c0_16] : memref<1x512xf32, #tpu.memory_space<vmem>>, vector<1x512xf32>
    %21 = vector.broadcast %20 : vector<1x512xf32> to vector<32x512xf32>
    %22 = arith.addf %19, %21 : vector<32x512xf32>
    %cst_17 = arith.constant 0.000000e+00 : f32
    %23 = vector.broadcast %cst_17 : f32 to vector<32x512xf32>
    %24 = arith.cmpf ogt, %22, %23 : vector<32x512xf32>
    %cst_18 = arith.constant 0.00999999977 : f32
    %25 = vector.broadcast %cst_18 : f32 to vector<32x512xf32>
    %26 = arith.mulf %25, %22 : vector<32x512xf32>
    %27 = arith.select %24, %22, %26 : vector<32x512xi1>, vector<32x512xf32>
    %28 = arith.truncf %27 : vector<32x512xf32> to vector<32x512xbf16>
    %c0_19 = arith.constant 0 : index
    %c0_20 = arith.constant 0 : index
    %29 = vector.load %arg8[%c0_19, %c0_20] : memref<512x512xbf16, #tpu.memory_space<vmem>>, vector<512x512xbf16>
    %cst_21 = arith.constant dense<0.000000e+00> : vector<32x512xf32>
    %30 = tpu.matmul %28, %29, %cst_21 {dimension_numbers = #tpu.dot_dimension_numbers<[1], [0], [0], [1], [0, 0, 1, 1], [], []>} : vector<32x512xbf16>, vector<512x512xbf16>, vector<32x512xf32> -> vector<32x512xf32>
    %c0_22 = arith.constant 0 : index
    %c0_23 = arith.constant 0 : index
    %31 = vector.load %arg9[%c0_22, %c0_23] : memref<1x512xf32, #tpu.memory_space<vmem>>, vector<1x512xf32>
    %32 = vector.broadcast %31 : vector<1x512xf32> to vector<32x512xf32>
    %33 = arith.addf %30, %32 : vector<32x512xf32>
    %cst_24 = arith.constant 0.000000e+00 : f32
    %34 = vector.broadcast %cst_24 : f32 to vector<32x512xf32>
    %35 = arith.cmpf ogt, %33, %34 : vector<32x512xf32>
    %cst_25 = arith.constant 0.00999999977 : f32
    %36 = vector.broadcast %cst_25 : f32 to vector<32x512xf32>
    %37 = arith.mulf %36, %33 : vector<32x512xf32>
    %38 = arith.select %35, %33, %37 : vector<32x512xi1>, vector<32x512xf32>
    %39 = arith.truncf %38 : vector<32x512xf32> to vector<32x512xbf16>
    %c0_26 = arith.constant 0 : index
    %c0_27 = arith.constant 0 : index
    %40 = vector.load %arg10[%c0_26, %c0_27] : memref<512x4xbf16, #tpu.memory_space<vmem>>, vector<512x4xbf16>
    %cst_28 = arith.constant dense<0.000000e+00> : vector<32x4xf32>
    %41 = tpu.matmul %39, %40, %cst_28 {dimension_numbers = #tpu.dot_dimension_numbers<[1], [0], [0], [1], [0, 0, 1, 1], [], []>} : vector<32x512xbf16>, vector<512x4xbf16>, vector<32x4xf32> -> vector<32x4xf32>
    %c0_29 = arith.constant 0 : index
    %c0_30 = arith.constant 0 : index
    %42 = vector.load %arg11[%c0_29, %c0_30] : memref<1x4xf32, #tpu.memory_space<vmem>>, vector<1x4xf32>
    %43 = vector.broadcast %42 : vector<1x4xf32> to vector<32x4xf32>
    %44 = arith.addf %41, %43 : vector<32x4xf32>
    %cst_31 = arith.constant dense<0xFF800000> : vector<32xf32>
    %45 = vector.multi_reduction <maximumf>, %44, %cst_31 [1] : vector<32x4xf32> to vector<32xf32>
    %46 = vector.shape_cast %45 : vector<32xf32> to vector<32x1xf32>
    %47 = vector.broadcast %46 : vector<32x1xf32> to vector<32x4xf32>
    %48 = arith.subf %44, %47 : vector<32x4xf32>
    %49 = math.exp %48 : vector<32x4xf32>
    %cst_32 = arith.constant dense<0.000000e+00> : vector<32xf32>
    %50 = vector.multi_reduction <add>, %49, %cst_32 [1] : vector<32x4xf32> to vector<32xf32>
    %51 = vector.shape_cast %50 : vector<32xf32> to vector<32x1xf32>
    %52 = tpu.reciprocal %51 {approx = true} : vector<32x1xf32> -> vector<32x1xf32>
    %53 = vector.broadcast %52 : vector<32x1xf32> to vector<32x4xf32>
    %54 = arith.mulf %49, %53 : vector<32x4xf32>
    %c0_33 = arith.constant 0 : index
    %c0_34 = arith.constant 0 : index
    %55 = vector.load %arg12[%c0_33, %c0_34] : memref<32x4xf32, #tpu.memory_space<vmem>>, vector<32x4xf32>
    tpu.vector_store %arg12[%c0_33, %c0_34], %54 {strides = array<i32>} : memref<32x4xf32, #tpu.memory_space<vmem>>, vector<32x4xf32>,
    return
  }
  func.func @transform_0(%arg0: i32) -> (i32, i32) {
    %c0_i32 = arith.constant 0 : i32
    %c0_i32_0 = arith.constant 0 : i32
    return %arg0, %c0_i32 : i32, i32
  }
  func.func @transform_1(%arg0: i32) -> (i32, i32) {
    %c0_i32 = arith.constant 0 : i32
    %c0_i32_0 = arith.constant 0 : i32
    return %arg0, %c0_i32 : i32, i32
  }
  func.func @transform_2(%arg0: i32) -> (i32, i32) {
    %c0_i32 = arith.constant 0 : i32
    %c0_i32_0 = arith.constant 0 : i32
    %c0_i32_1 = arith.constant 0 : i32
    return %c0_i32, %c0_i32_0 : i32, i32
  }
  func.func @transform_3(%arg0: i32) -> (i32, i32) {
    %c0_i32 = arith.constant 0 : i32
    %c0_i32_0 = arith.constant 0 : i32
    %c0_i32_1 = arith.constant 0 : i32
    return %c0_i32, %c0_i32_0 : i32, i32
  }
  func.func @transform_4(%arg0: i32) -> (i32, i32) {
    %c0_i32 = arith.constant 0 : i32
    %c0_i32_0 = arith.constant 0 : i32
    %c0_i32_1 = arith.constant 0 : i32
    return %c0_i32, %c0_i32_0 : i32, i32
  }
  func.func @transform_5(%arg0: i32) -> (i32, i32) {
    %c0_i32 = arith.constant 0 : i32
    %c0_i32_0 = arith.constant 0 : i32
    %c0_i32_1 = arith.constant 0 : i32
    return %c0_i32, %c0_i32_0 : i32, i32
  }
  func.func @transform_6(%arg0: i32) -> (i32, i32) {
    %c0_i32 = arith.constant 0 : i32
    %c0_i32_0 = arith.constant 0 : i32
    %c0_i32_1 = arith.constant 0 : i32
    return %c0_i32, %c0_i32_0 : i32, i32
  }
  func.func @transform_7(%arg0: i32) -> (i32, i32) {
    %c0_i32 = arith.constant 0 : i32
    %c0_i32_0 = arith.constant 0 : i32
    %c0_i32_1 = arith.constant 0 : i32
    return %c0_i32, %c0_i32_0 : i32, i32
  }
  func.func @transform_8(%arg0: i32) -> (i32, i32) {
    %c0_i32 = arith.constant 0 : i32
    %c0_i32_0 = arith.constant 0 : i32
    %c0_i32_1 = arith.constant 0 : i32
    return %c0_i32, %c0_i32_0 : i32, i32
  }
  func.func @transform_9(%arg0: i32) -> (i32, i32) {
    %c0_i32 = arith.constant 0 : i32
    %c0_i32_0 = arith.constant 0 : i32
    %c0_i32_1 = arith.constant 0 : i32
    return %c0_i32, %c0_i32_0 : i32, i32
  }
  func.func @transform_10(%arg0: i32) -> (i32, i32) {
    %c0_i32 = arith.constant 0 : i32
    %c0_i32_0 = arith.constant 0 : i32
    %c0_i32_1 = arith.constant 0 : i32
    return %c0_i32, %c0_i32_0 : i32, i32
  }
  func.func @transform_11(%arg0: i32) -> (i32, i32) {
    %c0_i32 = arith.constant 0 : i32
    %c0_i32_0 = arith.constant 0 : i32
    return %arg0, %c0_i32 : i32, i32
  }
}

</mosaic_0001>

<bundles_post_ra>
// kernel: inverse_model_forward.1
= control target key start
LH: loop header
LB: loop body
LE: loop exit
PB: predicated region body
PF: predicated region fallthrough
CT: control target
= control target key end

     0   :  { %16 = vsyncpa [#allocation3], 0  ;;  %s4007_s0 = inlined_call_operand.vmem [shape: f32[64,32], index: 0, kind: input, shape index: {}]   ;;  %s4008_s1 = inlined_call_operand.vmem [shape: f32[64,32], index: 1, kind: input, shape index: {}]   ;;  %s4009_s2 = inlined_call_operand.vmem [shape: bf16[32,256], index: 2, kind: input, shape index: {}]   ;;  %s4010_s3 = inlined_call_operand.vmem [shape: bf16[32,256], index: 3, kind: input, shape index: {}]   ;;  %s4011_s4 = inlined_call_operand.vmem [shape: f32[1,256], index: 4, kind: input, shape index: {}]   ;;  %s4012_s5 = inlined_call_operand.hbm [shape: bf16[256,512], index: 5, kind: input, shape index: {}]   ;;  %s4013_s6 = inlined_call_operand.vmem [shape: f32[1,512], index: 6, kind: input, shape index: {}]   ;;  %s4014_s7 = inlined_call_operand.hbm [shape: bf16[512,512], index: 7, kind: input, shape index: {}]   ;;  %s4015_s8 = inlined_call_operand.vmem [shape: f32[1,512], index: 8, kind: input, shape index: {}]   ;;  %s4016_s9 = inlined_call_operand.vmem [shape: bf16[512,4], index: 9, kind: input, shape index: {}]   ;;  %s4017_s10 = inlined_call_operand.vmem [shape: f32[1,4], index: 10, kind: input, shape index: {}]   ;;  %s4018_s11 = inlined_call_operand.vmem [shape: f32[64,4], index: 11, kind: output, shape index: {}]  }
   0x1   :  { %17 = vsyncpa [#allocation5], 0  ;;  %s3663_s17 = smov 0  }
   0x2 LB: > { %s2796_s18 = sadd.s32 4294967295, %s3596_s17   ;;  %p2798_p0 = scmp.ge.s32.totalorder %s3596_s17, 1  ;;  %s3596_s17 = sphi %s3663_s17, %s23_s17  }
   0x3   : > { %p295_p1 = scmp.lt.s32.totalorder %s3596_s17, 3  ;;  %s3598_s19 = smov [#allocation2]  }
   0x4   : > { %s316_s20 = sshll.u32 %s3598_s19, 4  ;;  %p3677_p3 = scmp.eq.s32.totalorder %s2796_s18, 0  ;;  %s317_s20 = int_to_ptr.vmem [resolvable:$true] %s316_s20 }
   0x5   : > { %p3671_p2 = pnand %p2798_p0, %p295_p1  ;;  %s3599_s23 = smov [#allocation4]  }
   0x6   : > { %s4023_s22 = scalar_select %p3677_p3, 1, 0 }
   0x7   : > { %s4022_s21 = scalar_select %p3671_p2, 1, 0 }
   0x8   : > { %p3154_p4 = pneg %p3671_p2  ;;  %s332_s24 = sshll.u32 %s3599_s23, 4  ;;  %s3689_s24 = int_to_ptr.vmem [resolvable:$true] %s332_s24 }
   0x9   : > { %s3526_s28 = scalar_lea.hbm %s4012_s5, 8192 }
   0xa   : > { %p3685_p5 = pnand %p3677_p3, %p3154_p4  ;;  %p3527_p6 = scmp.ne.s32.totalorder %s4012_s5, %s3526_s28 }
   0xb   : > { %p3533_p10 = scmp.lt.u32.totalorder %s3526_s28, %s4012_s5 }
   0xc   : > { %p3528_p7 = pneg %p3685_p5 }
   0xe   : > { %p3529_p8 = pnand %p3528_p7, %p3527_p6 }
  0x10   : > { %p3530_p9 = pneg %p3529_p8 }
  0x12   : > { %p3535_p11 = pnand %p3533_p10, %p3530_p9 }
  0x14   : > { %3538 = shalt.err (!%p3535_p11)
}
  0x15   : > { %s3539_s14 = scalar_lea.vmem %s317_s20, 8192  ;;  %p3547_p1 = scmp.lt.s32.totalorder %s317_s20, %s317_s20 }
  0x16   : > { %p3540_p12 = scmp.ne.s32.totalorder %s317_s20, %s3539_s14  ;;  %p3548_p4 = scmp.lt.s32.totalorder %s3539_s14, %s3539_s14 }
  0x18   : > { %p3542_p13 = pnand %p3540_p12, %p3528_p7  ;;  %p3549_p3 = por %p3548_p4, %p3547_p1 }
  0x1a   : > { %p3543_p0 = pneg %p3542_p13 }
  0x1c   : > { %p3550_p2 = pnand %p3549_p3, %p3543_p0 }
  0x1e   : > { %3553 = shalt.err (!%p3550_p2)
}
  0x1f   : > { %s3600_s15 = smov 256   ;;  %s3601_s16 = smov 16  }
  0x20   : > { %3157 = dma.hbm_to_vmem [thread:$0]  (!%p3685_p5), %s4012_s5, 8192, %s317_s20, [#allocation3], %s3600_s15, %s3600_s15, %s3601_s16  }
  0x21   : > { %s3554_s28 = scalar_lea.hbm %s4014_s7, 16384 }
  0x22   : > { %p3555_p6 = scmp.ne.s32.totalorder %s4014_s7, %s3554_s28  ;;  %p3561_p8 = scmp.lt.u32.totalorder %s3554_s28, %s4014_s7 }
  0x24   : > { %p3557_p2 = pnand %p3555_p6, %p3528_p7 }
  0x26   : > { %p3558_p3 = pneg %p3557_p2 }
  0x28   : > { %p3563_p9 = pnand %p3561_p8, %p3558_p3 }
  0x2a   : > { %3566 = shalt.err (!%p3563_p9)
}
  0x2b   : > { %s3567_s20 = scalar_lea.vmem %s3689_s24, 16384  ;;  %p3575_p13 = scmp.lt.s32.totalorder %s3689_s24, %s3689_s24 }
  0x2c   : > { %p3568_p10 = scmp.ne.s32.totalorder %s3689_s24, %s3567_s20  ;;  %p3576_p0 = scmp.lt.s32.totalorder %s3567_s20, %s3567_s20 }
  0x2e   : > { %p3570_p11 = pnand %p3568_p10, %p3528_p7  ;;  %p3577_p1 = por %p3576_p0, %p3575_p13 }
  0x30   : > { %p3571_p12 = pneg %p3570_p11 }
  0x32   : > { %p3578_p4 = pnand %p3577_p1, %p3571_p12 }
  0x34   : > { %3581 = shalt.err (!%p3578_p4)
}
  0x35   : > { %3160 = dma.hbm_to_vmem [thread:$0]  (!%p3685_p5), %s4014_s7, 16384, %s3689_s24, [#allocation5], %s3600_s15, %s3600_s15, %s3601_s16  }
  0x36   : > { %p4025_p6 = scmp.ne.s32.totalorder %s4022_s21, 0 }
  0x37   : > { %p4026_p2 = scmp.ne.s32.totalorder (!%p4025_p6), %s4023_s22, 0 }
  0x38   : > { %375 = sbr.rel (%p4025_p6) target bundleno = 1364 (0x554), region = 64 }
  0x3f   : > { %3587 = dma.done.wait (%p4026_p2), [#allocation3], 8192  }
  0x40   : > { %3589 = vsyncadd (%p4026_p2), [#allocation3], 4294959104 }
  0x41   : > { %3591 = dma.done.wait (%p4026_p2), [#allocation5], 16384  }
  0x42   : > { %3593 = vsyncadd (%p4026_p2), [#allocation5], 4294950912  ;;  %s2805_s25 = sshll.u32 %s2796_s18, 2  ;;  %v3602_v0 = vmov 0   ;;  %v3178_v1 = vld [vmem:[%s4010_s3 + $0x4] ss:$8 sps:$4 sm:$0xff]  }
  0x43   : > { %522 = vmatprep.mubr.bf16.mxu1 %v3602_v0  ;;  %601 = vmatprep.mubr.bf16.mxu0 %v3602_v0  ;;  %p425_p5 = scmp.lt.s32.totalorder %s2805_s25, 7  ;;  %v3180_v2 = vld [vmem:[%s4009_s2 + $0x4] ss:$8 sps:$4 sm:$0xff]   ;;  %v3182_v3 = vld [vmem:[%s4010_s3] ss:$8 sps:$4 sm:$0xff]   ;;  %vm483_vm0 = vcmask 261120  }
  0x44   : > { %490 = vmatprep.subr.bf16.mxu1 %v3178_v1  ;;  %v3183_v4 = vld [vmem:[%s4009_s2] ss:$8 sps:$4 sm:$0xff]   ;;  %569 = vmatprep.subr.bf16.mxu0 %v3180_v2  ;;  %v3184_v5 = vld [vmem:[%s4010_s3 + $0x14] ss:$8 sps:$4 sm:$0xff]   ;;  %v3188_v7 = vld [vmem:[%s4010_s3 + $0x10] ss:$8 sps:$4 sm:$0xff]  }
  0x45   : > { %s4028_s25 = smov (!%p425_p5, %s2805_s25), 7  ;;  %491 = vmatpush1.bf16.msra.mxu1 %v3182_v3  ;;  %570 = vmatpush1.bf16.msra.mxu0 %v3183_v4  ;;  %v3186_v6 = vld [vmem:[%s4009_s2 + $0x14] ss:$8 sps:$4 sm:$0xff]   ;;  %v3189_v8 = vld [vmem:[%s4009_s2 + $0x10] ss:$8 sps:$4 sm:$0xff]  }
  0x46   : > { %s3750_s21 = sshll.u32 %s4028_s25, 3  ;;  %492 = vmatprep.subr.bf16.mxu1 %v3184_v5  ;;  %571 = vmatprep.subr.bf16.mxu0 %v3186_v6  ;;  %v3190_v15 = vld [vmem:[#allocation2] ss:$16 sps:$4 sm:$0xff]   ;;  %v3192_v16 = vld [vmem:[#allocation2 + $0x4] ss:$16 sps:$4 sm:$0xff]  }
  0x47   : > { %s434_s30 = scalar_lea.vmem %s4008_s1, %s3750_s21  ;;  %s428_s19 = scalar_lea.vmem %s4007_s0, %s3750_s21  ;;  %v3193_v19 = vld [vmem:[#allocation2 + $0x8] ss:$16 sps:$4 sm:$0xff]   ;;  %v3195_v20 = vld [vmem:[#allocation2 + $0xc] ss:$16 sps:$4 sm:$0xff]   ;;  %v3198_v22 = vld [vmem:[#allocation2 + $0x24] ss:$16 sps:$4 sm:$0xff]  }
  0x48   : > { %v449_v9 = vld [vmem:[%s434_s30] sm:$0xff]  ;;  %v450_v10 = vld [vmem:[%s434_s30 + $0x8] sm:$0xff]  ;;  %v451_v17 = vld [vmem:[%s434_s30 + $0x10] sm:$0xff]  ;;  %s440_s12 = scalar_lea.vmem %s4018_s11, %s3750_s21 }
  0x49   : > { %v443_v11 = vld [vmem:[%s428_s19] sm:$0xff]  ;;  %v444_v12 = vld [vmem:[%s428_s19 + $0x8] sm:$0xff]  ;;  %v453_v13 = vpack.c.bf16 %v450_v10, %v449_v9  ;;  %493 = vmatpush1.bf16.msra.mxu1 %v3188_v7  ;;  %572 = vmatpush1.bf16.msra.mxu0 %v3189_v8  ;;  %v452_v18 = vld [vmem:[%s434_s30 + $0x18] sm:$0xff] }
  0x4a   : > { %v447_v14 = vpack.c.bf16 %v444_v12, %v443_v11  ;;  %v445_v21 = vld [vmem:[%s428_s19 + $0x10] sm:$0xff]  ;;  %v446_v23 = vld [vmem:[%s428_s19 + $0x18] sm:$0xff]  ;;  %1076 = vmatprep.subr.bf16.mxu1 %v3192_v16  ;;  %1129 = vmatprep.subr.bf16.mxu0 %v3195_v20  ;;  %v454_v27 = vpack.c.bf16 %v452_v18, %v451_v17 }
  0x4b   : > { %v3201_v24 = vld [vmem:[#allocation2 + $0x2c] ss:$16 sps:$4 sm:$0xff]   ;;  %v3196_v25 = vld [vmem:[#allocation2 + $0x20] ss:$16 sps:$4 sm:$0xff]   ;;  %v3199_v26 = vld [vmem:[#allocation2 + $0x28] ss:$16 sps:$4 sm:$0xff]   ;;  %v448_v28 = vpack.c.bf16 %v446_v23, %v445_v21  ;;  %v624_v23 = vlaneseq }
  0x4c   : > { %2815 = vmatmul.mubr.msk.bf16.vlgmr.msra.gmra.mrb[0].mxu1 %vm483_vm0, %v453_v13  ;;  %2821 = vmatmul.mubr.msk.bf16.vlgmr.msra.gmra.mrb[0].mxu0 %vm483_vm0, %v447_v14  ;;  %v3204_v29 = vld [vmem:[#allocation2 + $0x44] ss:$16 sps:$4 sm:$0xff]   ;;  %v3207_v30 = vld [vmem:[#allocation2 + $0x4c] ss:$16 sps:$4 sm:$0xff]   ;;  %v3202_v31 = vld [vmem:[#allocation2 + $0x40] ss:$16 sps:$4 sm:$0xff]  }
  0x4d   : > { %532 = vmatprep.mubr.bf16.mxu1 %v3602_v0  ;;  %611 = vmatprep.mubr.bf16.mxu0 %v3602_v0  ;;  %v3205_v32 = vld [vmem:[#allocation2 + $0x48] ss:$16 sps:$4 sm:$0xff]   ;;  %v3210_v33 = vld [vmem:[#allocation2 + $0x64] ss:$16 sps:$4 sm:$0xff]   ;;  %v3213_v34 = vld [vmem:[#allocation2 + $0x6c] ss:$16 sps:$4 sm:$0xff]  }
  0x4e   : > { %1077 = vmatpush1.bf16.msra.mxu1 %v3190_v15  ;;  %1130 = vmatpush1.bf16.msra.mxu0 %v3193_v19  ;;  %v3208_v35 = vld [vmem:[#allocation2 + $0x60] ss:$16 sps:$4 sm:$0xff]   ;;  %v3211_v36 = vld [vmem:[#allocation2 + $0x68] ss:$16 sps:$4 sm:$0xff]   ;;  %v3216_v37 = vld [vmem:[#allocation2 + $0x84] ss:$16 sps:$4 sm:$0xff]  }
  0x4f   : > { %1078 = vmatprep.subr.bf16.mxu1 %v3198_v22  ;;  %1131 = vmatprep.subr.bf16.mxu0 %v3201_v24  ;;  %v3219_v38 = vld [vmem:[#allocation2 + $0x8c] ss:$16 sps:$4 sm:$0xff]   ;;  %v3214_v39 = vld [vmem:[#allocation2 + $0x80] ss:$16 sps:$4 sm:$0xff]   ;;  %v3217_v40 = vld [vmem:[#allocation2 + $0x88] ss:$16 sps:$4 sm:$0xff]  }
  0x50   : > { %v3222_v41 = vld [vmem:[#allocation2 + $0xa4] ss:$16 sps:$4 sm:$0xff]   ;;  %v3225_v42 = vld [vmem:[#allocation2 + $0xac] ss:$16 sps:$4 sm:$0xff]   ;;  %v3220_v43 = vld [vmem:[#allocation2 + $0xa0] ss:$16 sps:$4 sm:$0xff]  }
  0x51   : > { %v3223_v44 = vld [vmem:[#allocation2 + $0xa8] ss:$16 sps:$4 sm:$0xff]   ;;  %v3228_v45 = vld [vmem:[#allocation2 + $0xc4] ss:$16 sps:$4 sm:$0xff]   ;;  %v3231_v46 = vld [vmem:[#allocation2 + $0xcc] ss:$16 sps:$4 sm:$0xff]  }
  0x52   : > { %1079 = vmatpush1.bf16.msra.mxu1 %v3196_v25  ;;  %1132 = vmatpush1.bf16.msra.mxu0 %v3199_v26  ;;  %v3226_v47 = vld [vmem:[#allocation2 + $0xc0] ss:$16 sps:$4 sm:$0xff]   ;;  %v3229_v48 = vld [vmem:[#allocation2 + $0xc8] ss:$16 sps:$4 sm:$0xff]   ;;  %v3234_v49 = vld [vmem:[#allocation2 + $0xe4] ss:$16 sps:$4 sm:$0xff]  }
  0x53   : > { %1080 = vmatprep.subr.bf16.mxu1 %v3204_v29  ;;  %1133 = vmatprep.subr.bf16.mxu0 %v3207_v30  ;;  %v3237_v50 = vld [vmem:[#allocation2 + $0xec] ss:$16 sps:$4 sm:$0xff]   ;;  %v3232_v51 = vld [vmem:[#allocation2 + $0xe0] ss:$16 sps:$4 sm:$0xff]   ;;  %v3235_v52 = vld [vmem:[#allocation2 + $0xe8] ss:$16 sps:$4 sm:$0xff]  }
  0x54   : > { %2816 = vmatmul.mubr.msk.bf16.gmra.mrb[4].mxu1 %vm483_vm0, %v454_v27  ;;  %2822 = vmatmul.mubr.msk.bf16.gmra.mrb[4].mxu0 %vm483_vm0, %v448_v28  ;;  %v3240_v53 = vld [vmem:[#allocation2 + $0x104] ss:$16 sps:$4 sm:$0xff]   ;;  %v3243_v54 = vld [vmem:[#allocation2 + $0x10c] ss:$16 sps:$4 sm:$0xff]   ;;  %v3238_v55 = vld [vmem:[#allocation2 + $0x100] ss:$16 sps:$4 sm:$0xff]  }
  0x55   : > { %v3241_v56 = vld [vmem:[#allocation2 + $0x108] ss:$16 sps:$4 sm:$0xff]   ;;  %v3246_v57 = vld [vmem:[#allocation2 + $0x124] ss:$16 sps:$4 sm:$0xff]   ;;  %v3249_v58 = vld [vmem:[#allocation2 + $0x12c] ss:$16 sps:$4 sm:$0xff]  }
  0x56   : > { %1081 = vmatpush1.bf16.msra.mxu1 %v3202_v31  ;;  %1134 = vmatpush1.bf16.msra.mxu0 %v3205_v32  ;;  %v3244_v59 = vld [vmem:[#allocation2 + $0x120] ss:$16 sps:$4 sm:$0xff]   ;;  %v3247_v60 = vld [vmem:[#allocation2 + $0x128] ss:$16 sps:$4 sm:$0xff]   ;;  %v3252_v61 = vld [vmem:[#allocation2 + $0x144] ss:$16 sps:$4 sm:$0xff]  }
  0x57   : > { %1082 = vmatprep.subr.bf16.mxu1 %v3210_v33  ;;  %1135 = vmatprep.subr.bf16.mxu0 %v3213_v34  ;;  %v3255_v62 = vld [vmem:[#allocation2 + $0x14c] ss:$16 sps:$4 sm:$0xff]   ;;  %v3250_v63 = vld [vmem:[#allocation2 + $0x140] ss:$16 sps:$4 sm:$0xff]   ;;  %v3253_v0 = vld [vmem:[#allocation2 + $0x148] ss:$16 sps:$4 sm:$0xff]  }
  0x58   : > { %v3258_v1 = vld [vmem:[#allocation2 + $0x164] ss:$16 sps:$4 sm:$0xff]   ;;  %v3261_v2 = vld [vmem:[#allocation2 + $0x16c] ss:$16 sps:$4 sm:$0xff]   ;;  %v3256_v3 = vld [vmem:[#allocation2 + $0x160] ss:$16 sps:$4 sm:$0xff]  }
  0x59   : > { %v3259_v4 = vld [vmem:[#allocation2 + $0x168] ss:$16 sps:$4 sm:$0xff]   ;;  %v3264_v5 = vld [vmem:[#allocation2 + $0x184] ss:$16 sps:$4 sm:$0xff]   ;;  %v3267_v6 = vld [vmem:[#allocation2 + $0x18c] ss:$16 sps:$4 sm:$0xff]  }
  0x5a   : > { %1083 = vmatpush1.bf16.msra.mxu1 %v3208_v35  ;;  %1136 = vmatpush1.bf16.msra.mxu0 %v3211_v36  ;;  %v3262_v7 = vld [vmem:[#allocation2 + $0x180] ss:$16 sps:$4 sm:$0xff]   ;;  %v3265_v8 = vld [vmem:[#allocation2 + $0x188] ss:$16 sps:$4 sm:$0xff]   ;;  %v3270_v9 = vld [vmem:[#allocation2 + $0x1a4] ss:$16 sps:$4 sm:$0xff]  }
  0x5b   : > { %1084 = vmatprep.subr.bf16.mxu1 %v3216_v37  ;;  %1137 = vmatprep.subr.bf16.mxu0 %v3219_v38  ;;  %v3268_v10 = vld [vmem:[#allocation2 + $0x1a0] ss:$16 sps:$4 sm:$0xff]   ;;  %v3271_v11 = vld [vmem:[#allocation2 + $0x1a8] ss:$16 sps:$4 sm:$0xff]   ;;  %v3273_v12 = vld [vmem:[#allocation2 + $0x1ac] ss:$16 sps:$4 sm:$0xff]  }
  0x5c   : > { %v3276_v13 = vld [vmem:[#allocation2 + $0x1c4] ss:$16 sps:$4 sm:$0xff]   ;;  %v3279_v14 = vld [vmem:[#allocation2 + $0x1cc] ss:$16 sps:$4 sm:$0xff]   ;;  %v3274_v15 = vld [vmem:[#allocation2 + $0x1c0] ss:$16 sps:$4 sm:$0xff]  }
  0x5d   : > { %v3277_v16 = vld [vmem:[#allocation2 + $0x1c8] ss:$16 sps:$4 sm:$0xff]   ;;  %v3282_v17 = vld [vmem:[#allocation2 + $0x1e4] ss:$16 sps:$4 sm:$0xff]   ;;  %v3285_v18 = vld [vmem:[#allocation2 + $0x1ec] ss:$16 sps:$4 sm:$0xff]  }
  0x5e   : > { %1085 = vmatpush1.bf16.msra.mxu1 %v3214_v39  ;;  %1138 = vmatpush1.bf16.msra.mxu0 %v3217_v40  ;;  %v3280_v19 = vld [vmem:[#allocation2 + $0x1e0] ss:$16 sps:$4 sm:$0xff]   ;;  %v3283_v20 = vld [vmem:[#allocation2 + $0x1e8] ss:$16 sps:$4 sm:$0xff]   ;;  %v3288_v21 = vld [vmem:[#allocation4 + $0x4] ss:$16 sps:$4 sm:$0xff]  }
  0x5f   : > { %1086 = vmatprep.subr.bf16.mxu1 %v3222_v41  ;;  %1139 = vmatprep.subr.bf16.mxu0 %v3225_v42  ;;  %v3291_v22 = vld [vmem:[#allocation4 + $0xc] ss:$16 sps:$4 sm:$0xff]   ;;  %v3788_v24 = vshrl.u32 %v624_v23, 7  ;;  %v622_v26 = vld [vmem:[%s4011_s4] sm:$0x3] }
  0x61   : > { %v3791_v25 = vsub.s32 0, %v3788_v24  ;;  %v3797_v27 = vsub.s32 1, %v3788_v24 }
  0x62   : > { %1087 = vmatpush1.bf16.msra.mxu1 %v3220_v43  ;;  %1140 = vmatpush1.bf16.msra.mxu0 %v3223_v44 }
  0x63   : > { %1088 = vmatprep.subr.bf16.mxu1 %v3228_v45  ;;  %1141 = vmatprep.subr.bf16.mxu0 %v3231_v46  ;;  %v627_v28 = vrot.slane %v622_v26, %v3791_v25  ;;  %v631_v31 = vrot.slane %v622_v26, %v3797_v27 }
  0x66   : > { %1089 = vmatpush1.bf16.msra.mxu1 %v3226_v47  ;;  %1142 = vmatpush1.bf16.msra.mxu0 %v3229_v48 }
  0x67   : > { %1090 = vmatprep.subr.bf16.mxu1 %v3234_v49  ;;  %1143 = vmatprep.subr.bf16.mxu0 %v3237_v50 }
  0x6a   : > { %1091 = vmatpush1.bf16.msra.mxu1 %v3232_v51  ;;  %1144 = vmatpush1.bf16.msra.mxu0 %v3235_v52 }
  0x6b   : > { %1092 = vmatprep.subr.bf16.mxu1 %v3240_v53  ;;  %1145 = vmatprep.subr.bf16.mxu0 %v3243_v54 }
  0x6e   : > { %1093 = vmatpush1.bf16.msra.mxu1 %v3238_v55  ;;  %1146 = vmatpush1.bf16.msra.mxu0 %v3241_v56 }
  0x6f   : > { %1094 = vmatprep.subr.bf16.mxu1 %v3246_v57  ;;  %1147 = vmatprep.subr.bf16.mxu0 %v3249_v58 }
  0x72   : > { %1095 = vmatpush1.bf16.msra.mxu1 %v3244_v59  ;;  %1148 = vmatpush1.bf16.msra.mxu0 %v3247_v60 }
  0x73   : > { %1096 = vmatprep.subr.bf16.mxu1 %v3252_v61  ;;  %1149 = vmatprep.subr.bf16.mxu0 %v3255_v62 }
  0x76   : > { %1097 = vmatpush1.bf16.msra.mxu1 %v3250_v63  ;;  %1150 = vmatpush1.bf16.msra.mxu0 %v3253_v0 }
  0x77   : > { %1098 = vmatprep.subr.bf16.mxu1 %v3258_v1  ;;  %1151 = vmatprep.subr.bf16.mxu0 %v3261_v2 }
  0x7a   : > { %1099 = vmatpush1.bf16.msra.mxu1 %v3256_v3  ;;  %1152 = vmatpush1.bf16.msra.mxu0 %v3259_v4  ;;  %v3286_v4 = vld [vmem:[#allocation4] ss:$16 sps:$4 sm:$0xff]  }
  0x7b   : > { %1100 = vmatprep.subr.bf16.mxu1 %v3264_v5  ;;  %1153 = vmatprep.subr.bf16.mxu0 %v3267_v6  ;;  %v3289_v5 = vld [vmem:[#allocation4 + $0x8] ss:$16 sps:$4 sm:$0xff]  }
  0x7e   : > { %1101 = vmatpush1.bf16.msra.mxu1 %v3262_v7  ;;  %1154 = vmatpush1.bf16.msra.mxu0 %v3265_v8  ;;  %v3294_v8 = vld [vmem:[#allocation4 + $0x24] ss:$16 sps:$4 sm:$0xff]  }
  0x7f   : > { %1102 = vmatprep.subr.bf16.mxu1 %v3270_v9  ;;  %1155 = vmatprep.subr.bf16.mxu0 %v3273_v12  ;;  %v3297_v9 = vld [vmem:[#allocation4 + $0x2c] ss:$16 sps:$4 sm:$0xff]   ;;  %v3292_v12 = vld [vmem:[#allocation4 + $0x20] ss:$16 sps:$4 sm:$0xff]  }
  0x82   : > { %1103 = vmatpush1.bf16.msra.mxu1 %v3268_v10  ;;  %1156 = vmatpush1.bf16.msra.mxu0 %v3271_v11 }
  0x83   : > { %1104 = vmatprep.subr.bf16.mxu1 %v3276_v13  ;;  %1157 = vmatprep.subr.bf16.mxu0 %v3279_v14 }
  0x86   : > { %1105 = vmatpush1.bf16.msra.mxu1 %v3274_v15  ;;  %1158 = vmatpush1.bf16.msra.mxu0 %v3277_v16  ;;  %v3295_v15 = vld [vmem:[#allocation4 + $0x28] ss:$16 sps:$4 sm:$0xff]  }
  0x87   : > { %1106 = vmatprep.subr.bf16.mxu1 %v3282_v17  ;;  %1159 = vmatprep.subr.bf16.mxu0 %v3285_v18  ;;  %v3300_v18 = vld [vmem:[#allocation4 + $0x44] ss:$16 sps:$4 sm:$0xff]  }
  0x8a   : > { %1107 = vmatpush1.bf16.msra.mxu1 %v3280_v19  ;;  %1160 = vmatpush1.bf16.msra.mxu0 %v3283_v20 }
  0x8b   : > { %2028 = vmatprep.subr.bf16.mxu1 %v3288_v21  ;;  %2134 = vmatprep.subr.bf16.mxu0 %v3291_v22  ;;  %v3303_v21 = vld [vmem:[#allocation4 + $0x4c] ss:$16 sps:$4 sm:$0xff]  }
 0x11f   : > { %v524_v29 = vpop.f32.mrb[0].mxu1  ;;  %v603_v30 = vpop.f32.mrb[0].mxu0 }
 0x120   : > { %v604_v32 = vadd.f32 %v603_v30, %v524_v29  ;;  %v526_v33 = vpop.f32.mrb[1].mxu1  ;;  %v605_v34 = vpop.f32.mrb[1].mxu0  ;;  %v3298_v29 = vld [vmem:[#allocation4 + $0x40] ss:$16 sps:$4 sm:$0xff]   ;;  %v3301_v30 = vld [vmem:[#allocation4 + $0x48] ss:$16 sps:$4 sm:$0xff]  }
 0x121   : > { %v606_v35 = vadd.f32 %v605_v34, %v526_v33  ;;  %v528_v36 = vpop.f32.mrb[2].mxu1  ;;  %v607_v37 = vpop.f32.mrb[2].mxu0  ;;  %v3304_v33 = vld [vmem:[#allocation4 + $0x60] ss:$16 sps:$4 sm:$0xff]   ;;  %v3307_v34 = vld [vmem:[#allocation4 + $0x68] ss:$16 sps:$4 sm:$0xff]  }
 0x122   : > { %v634_v38 = vadd.f32 %v627_v28, %v604_v32  ;;  %v608_v39 = vadd.f32 %v607_v37, %v528_v36  ;;  %v530_v40 = vpop.f32.mrb[3].mxu1  ;;  %v609_v41 = vpop.f32.mrb[3].mxu0  ;;  %v3309_v32 = vld [vmem:[#allocation4 + $0x6c] ss:$16 sps:$4 sm:$0xff]   ;;  %v3310_v37 = vld [vmem:[#allocation4 + $0x80] ss:$16 sps:$4 sm:$0xff]  }
 0x123   : > { %v635_v42 = vadd.f32 %v631_v31, %v606_v35  ;;  %v610_v43 = vadd.f32 %v609_v41, %v530_v40  ;;  %v3312_v35 = vld [vmem:[#allocation4 + $0x84] ss:$16 sps:$4 sm:$0xff]   ;;  %v3315_v36 = vld [vmem:[#allocation4 + $0x8c] ss:$16 sps:$4 sm:$0xff]   ;;  %v3316_v41 = vld [vmem:[#allocation4 + $0xa0] ss:$16 sps:$4 sm:$0xff]  }
 0x124   : > { %v650_v44 = vmul.f32 0.01, %v634_v38  ;;  %v636_v45 = vadd.f32 %v627_v28, %v608_v39  ;;  %vm642_vm1 = vcmp.gt.f32.partialorder %v634_v38, 0.0  ;;  %v3318_v39 = vld [vmem:[#allocation4 + $0xa4] ss:$16 sps:$4 sm:$0xff]  }
 0x125   : > { %v651_v46 = vmul.f32 0.01, %v635_v42  ;;  %v637_v47 = vadd.f32 %v631_v31, %v610_v43  ;;  %vm643_vm2 = vcmp.gt.f32.partialorder %v635_v42, 0.0  ;;  %v3321_v40 = vld [vmem:[#allocation4 + $0xac] ss:$16 sps:$4 sm:$0xff]  }
 0x126   : > { %vm644_vm3 = vcmp.gt.f32.partialorder %v636_v45, 0.0  ;;  %v652_v48 = vmul.f32 0.01, %v636_v45  ;;  %v658_v52 = vsel %vm642_vm1, %v634_v38, %v650_v44  ;;  %v3313_v38 = vld [vmem:[#allocation4 + $0x88] ss:$16 sps:$4 sm:$0xff]  }
 0x127   : > { %vm645_vm4 = vcmp.gt.f32.partialorder %v637_v47, 0.0  ;;  %v653_v49 = vmul.f32 0.01, %v637_v47  ;;  %v534_v50 = vpop.f32.mrb[4].mxu1  ;;  %v613_v51 = vpop.f32.mrb[4].mxu0  ;;  %v659_v61 = vsel %vm643_vm2, %v635_v42, %v651_v46 }
 0x128   : > { %v660_v53 = vsel %vm644_vm3, %v636_v45, %v652_v48  ;;  %v614_v54 = vadd.f32 %v613_v51, %v534_v50  ;;  %v536_v55 = vpop.f32.mrb[5].mxu1  ;;  %v615_v56 = vpop.f32.mrb[5].mxu0  ;;  %v3319_v42 = vld [vmem:[#allocation4 + $0xa8] ss:$16 sps:$4 sm:$0xff]   ;;  %v3324_v43 = vld [vmem:[#allocation4 + $0xc4] ss:$16 sps:$4 sm:$0xff]  }
 0x129   : > { %v666_v57 = vpack.c.bf16 %v660_v53, %v658_v52  ;;  %v616_v58 = vadd.f32 %v615_v56, %v536_v55  ;;  %v538_v59 = vpop.f32.mrb[6].mxu1  ;;  %v617_v60 = vpop.f32.mrb[6].mxu0  ;;  %v661_v62 = vsel %vm645_vm4, %v637_v47, %v653_v49  ;;  %v3327_v44 = vld [vmem:[#allocation4 + $0xcc] ss:$16 sps:$4 sm:$0xff]   ;;  %v3322_v45 = vld [vmem:[#allocation4 + $0xc0] ss:$16 sps:$4 sm:$0xff]  }
 0x12a   : > { %v638_v63 = vadd.f32 %v627_v28, %v614_v54  ;;  %v618_v0 = vadd.f32 %v617_v60, %v538_v59  ;;  %v540_v1 = vpop.f32.mrb[7].mxu1  ;;  %v619_v2 = vpop.f32.mrb[7].mxu0  ;;  %v667_v3 = vpack.c.bf16 %v661_v62, %v659_v61  ;;  %v3325_v46 = vld [vmem:[#allocation4 + $0xc8] ss:$16 sps:$4 sm:$0xff]   ;;  %v3330_v47 = vld [vmem:[#allocation4 + $0xe4] ss:$16 sps:$4 sm:$0xff]  }
 0x12b   : > { %v639_v6 = vadd.f32 %v631_v31, %v616_v58  ;;  %v620_v7 = vadd.f32 %v619_v2, %v540_v1  ;;  %v3333_v48 = vld [vmem:[#allocation4 + $0xec] ss:$16 sps:$4 sm:$0xff]   ;;  %v3328_v49 = vld [vmem:[#allocation4 + $0xe0] ss:$16 sps:$4 sm:$0xff]   ;;  %v3331_v50 = vld [vmem:[#allocation4 + $0xe8] ss:$16 sps:$4 sm:$0xff]  }
 0x12c   : > { %vm646_vm5 = vcmp.gt.f32.partialorder %v638_v63, 0.0  ;;  %v654_v10 = vmul.f32 0.01, %v638_v63  ;;  %v640_v11 = vadd.f32 %v627_v28, %v618_v0  ;;  %1108 = vmatprep.mubr.bf16.mxu1 %v667_v3  ;;  %1161 = vmatprep.mubr.bf16.mxu0 %v667_v3  ;;  %v3336_v51 = vld [vmem:[#allocation4 + $0x104] ss:$16 sps:$4 sm:$0xff]  }
 0x12d   : > { %vm647_vm6 = vcmp.gt.f32.partialorder %v639_v6, 0.0  ;;  %v655_v13 = vmul.f32 0.01, %v639_v6  ;;  %v641_v14 = vadd.f32 %v631_v31, %v620_v7  ;;  %1109 = vmatmul.mubr.bf16.vlgmr.msra.gmra.mrb[8].mxu1 %v666_v57  ;;  %1162 = vmatmul.mubr.bf16.vlgmr.msra.gmra.mrb[8].mxu0 %v666_v57  ;;  %v3306_v31 = vld [vmem:[#allocation4 + $0x64] ss:$16 sps:$4 sm:$0xff]  }
 0x12e   : > { %vm648_vm7 = vcmp.gt.f32.partialorder %v640_v11, 0.0  ;;  %v656_v16 = vmul.f32 0.01, %v640_v11  ;;  %v662_v17 = vsel %vm646_vm5, %v638_v63, %v654_v10  ;;  %2029 = vmatpush1.bf16.msra.mxu1 %v3286_v4  ;;  %2135 = vmatpush1.bf16.msra.mxu0 %v3289_v5  ;;  %v3339_v52 = vld [vmem:[#allocation4 + $0x10c] ss:$16 sps:$4 sm:$0xff]  }
 0x12f   : > { %vm649_vm8 = vcmp.gt.f32.partialorder %v641_v14, 0.0  ;;  %v657_v19 = vmul.f32 0.01, %v641_v14  ;;  %v663_v20 = vsel %vm647_vm6, %v639_v6, %v655_v13  ;;  %2030 = vmatprep.subr.bf16.mxu1 %v3294_v8  ;;  %2136 = vmatprep.subr.bf16.mxu0 %v3297_v9  ;;  %v3334_v53 = vld [vmem:[#allocation4 + $0x100] ss:$16 sps:$4 sm:$0xff]  }
 0x130   : > { %v664_v22 = vsel %vm648_vm7, %v640_v11, %v656_v16  ;;  %v3337_v54 = vld [vmem:[#allocation4 + $0x108] ss:$16 sps:$4 sm:$0xff]   ;;  %v3342_v55 = vld [vmem:[#allocation4 + $0x124] ss:$16 sps:$4 sm:$0xff]   ;;  %v3345_v56 = vld [vmem:[#allocation4 + $0x12c] ss:$16 sps:$4 sm:$0xff]  }
 0x131   : > { %v665_v23 = vsel %vm649_vm8, %v641_v14, %v657_v19  ;;  %v668_v26 = vpack.c.bf16 %v664_v22, %v662_v17  ;;  %v3340_v57 = vld [vmem:[#allocation4 + $0x120] ss:$16 sps:$4 sm:$0xff]   ;;  %v3343_v58 = vld [vmem:[#allocation4 + $0x128] ss:$16 sps:$4 sm:$0xff]   ;;  %v3348_v59 = vld [vmem:[#allocation4 + $0x144] ss:$16 sps:$4 sm:$0xff]  }
 0x132   : > { %v669_v28 = vpack.c.bf16 %v665_v23, %v663_v20  ;;  %2031 = vmatpush1.bf16.msra.mxu1 %v3292_v12  ;;  %2137 = vmatpush1.bf16.msra.mxu0 %v3295_v15  ;;  %v3351_v60 = vld [vmem:[#allocation4 + $0x14c] ss:$16 sps:$4 sm:$0xff]   ;;  %v3346_v61 = vld [vmem:[#allocation4 + $0x140] ss:$16 sps:$4 sm:$0xff]   ;;  %v3349_v62 = vld [vmem:[#allocation4 + $0x148] ss:$16 sps:$4 sm:$0xff]  }
 0x133   : > { %2032 = vmatprep.subr.bf16.mxu1 %v3300_v18  ;;  %2138 = vmatprep.subr.bf16.mxu0 %v3303_v21  ;;  %v3354_v63 = vld [vmem:[#allocation4 + $0x164] ss:$16 sps:$4 sm:$0xff]   ;;  %v3357_v0 = vld [vmem:[#allocation4 + $0x16c] ss:$16 sps:$4 sm:$0xff]   ;;  %v3352_v1 = vld [vmem:[#allocation4 + $0x160] ss:$16 sps:$4 sm:$0xff]  }
 0x134   : > { %1118 = vmatprep.mubr.bf16.mxu1 %v669_v28  ;;  %1171 = vmatprep.mubr.bf16.mxu0 %v669_v28  ;;  %v3355_v2 = vld [vmem:[#allocation4 + $0x168] ss:$16 sps:$4 sm:$0xff]   ;;  %v3360_v3 = vld [vmem:[#allocation4 + $0x184] ss:$16 sps:$4 sm:$0xff]   ;;  %v3363_v4 = vld [vmem:[#allocation4 + $0x18c] ss:$16 sps:$4 sm:$0xff]  }
 0x135   : > { %1119 = vmatmul.mubr.bf16.gmra.mrb[12].mxu1 %v668_v26  ;;  %1172 = vmatmul.mubr.bf16.gmra.mrb[12].mxu0 %v668_v26  ;;  %v3358_v5 = vld [vmem:[#allocation4 + $0x180] ss:$16 sps:$4 sm:$0xff]   ;;  %v3361_v6 = vld [vmem:[#allocation4 + $0x188] ss:$16 sps:$4 sm:$0xff]   ;;  %v3366_v7 = vld [vmem:[#allocation4 + $0x1a4] ss:$16 sps:$4 sm:$0xff]  }
 0x136   : > { %2033 = vmatpush1.bf16.msra.mxu1 %v3298_v29  ;;  %2139 = vmatpush1.bf16.msra.mxu0 %v3301_v30  ;;  %v3369_v8 = vld [vmem:[#allocation4 + $0x1ac] ss:$16 sps:$4 sm:$0xff]   ;;  %v3364_v9 = vld [vmem:[#allocation4 + $0x1a0] ss:$16 sps:$4 sm:$0xff]   ;;  %v3367_v10 = vld [vmem:[#allocation4 + $0x1a8] ss:$16 sps:$4 sm:$0xff]  }
 0x137   : > { %2034 = vmatprep.subr.bf16.mxu1 %v3306_v31  ;;  %2140 = vmatprep.subr.bf16.mxu0 %v3309_v32  ;;  %v3372_v11 = vld [vmem:[#allocation4 + $0x1c4] ss:$16 sps:$4 sm:$0xff]   ;;  %v3375_v12 = vld [vmem:[#allocation4 + $0x1cc] ss:$16 sps:$4 sm:$0xff]   ;;  %v3370_v13 = vld [vmem:[#allocation4 + $0x1c0] ss:$16 sps:$4 sm:$0xff]  }
 0x138   : > { %v3373_v14 = vld [vmem:[#allocation4 + $0x1c8] ss:$16 sps:$4 sm:$0xff]   ;;  %v3378_v15 = vld [vmem:[#allocation4 + $0x1e4] ss:$16 sps:$4 sm:$0xff]   ;;  %v3381_v16 = vld [vmem:[#allocation4 + $0x1ec] ss:$16 sps:$4 sm:$0xff]  }
 0x139   : > { %v3376_v17 = vld [vmem:[#allocation4 + $0x1e0] ss:$16 sps:$4 sm:$0xff]   ;;  %v3379_v18 = vld [vmem:[#allocation4 + $0x1e8] ss:$16 sps:$4 sm:$0xff]   ;;  %v3384_v19 = vld [vmem:[#allocation4 + $0x204] ss:$16 sps:$4 sm:$0xff]  }
 0x13a   : > { %2035 = vmatpush1.bf16.msra.mxu1 %v3304_v33  ;;  %2141 = vmatpush1.bf16.msra.mxu0 %v3307_v34  ;;  %v3387_v20 = vld [vmem:[#allocation4 + $0x20c] ss:$16 sps:$4 sm:$0xff]   ;;  %v746_v21 = vsub.s32 2, %v3788_v24  ;;  %v734_v22 = vld [vmem:[%s4013_s6] sm:$0xf]  ;;  %v750_v23 = vsub.s32 3, %v3788_v24 }
 0x13b   : > { %2036 = vmatprep.subr.bf16.mxu1 %v3312_v35  ;;  %2142 = vmatprep.subr.bf16.mxu0 %v3315_v36  ;;  %v739_v26 = vrot.slane %v734_v22, %v3791_v25  ;;  %v3813_v29 = vrot.slane %v734_v22, %v3797_v27 }
 0x13c   : > { %v3810_v28 = vrot.slane %v734_v22, %v746_v21  ;;  %v3817_v30 = vrot.slane %v734_v22, %v750_v23 }
 0x13e   : > { %2037 = vmatpush1.bf16.msra.mxu1 %v3310_v37  ;;  %2143 = vmatpush1.bf16.msra.mxu0 %v3313_v38 }
 0x13f   : > { %2038 = vmatprep.subr.bf16.mxu1 %v3318_v39  ;;  %2144 = vmatprep.subr.bf16.mxu0 %v3321_v40 }
 0x142   : > { %2039 = vmatpush1.bf16.msra.mxu1 %v3316_v41  ;;  %2145 = vmatpush1.bf16.msra.mxu0 %v3319_v42 }
 0x143   : > { %2040 = vmatprep.subr.bf16.mxu1 %v3324_v43  ;;  %2146 = vmatprep.subr.bf16.mxu0 %v3327_v44 }
 0x146   : > { %2041 = vmatpush1.bf16.msra.mxu1 %v3322_v45  ;;  %2147 = vmatpush1.bf16.msra.mxu0 %v3325_v46 }
 0x147   : > { %2042 = vmatprep.subr.bf16.mxu1 %v3330_v47  ;;  %2148 = vmatprep.subr.bf16.mxu0 %v3333_v48 }
 0x14a   : > { %2043 = vmatpush1.bf16.msra.mxu1 %v3328_v49  ;;  %2149 = vmatpush1.bf16.msra.mxu0 %v3331_v50 }
 0x14b   : > { %2044 = vmatprep.subr.bf16.mxu1 %v3336_v51  ;;  %2150 = vmatprep.subr.bf16.mxu0 %v3339_v52 }
 0x14e   : > { %2045 = vmatpush1.bf16.msra.mxu1 %v3334_v53  ;;  %2151 = vmatpush1.bf16.msra.mxu0 %v3337_v54 }
 0x14f   : > { %2046 = vmatprep.subr.bf16.mxu1 %v3342_v55  ;;  %2152 = vmatprep.subr.bf16.mxu0 %v3345_v56 }
 0x152   : > { %2047 = vmatpush1.bf16.msra.mxu1 %v3340_v57  ;;  %2153 = vmatpush1.bf16.msra.mxu0 %v3343_v58 }
 0x153   : > { %2048 = vmatprep.subr.bf16.mxu1 %v3348_v59  ;;  %2154 = vmatprep.subr.bf16.mxu0 %v3351_v60 }
 0x156   : > { %2049 = vmatpush1.bf16.msra.mxu1 %v3346_v61  ;;  %2155 = vmatpush1.bf16.msra.mxu0 %v3349_v62 }
 0x157   : > { %2050 = vmatprep.subr.bf16.mxu1 %v3354_v63  ;;  %2156 = vmatprep.subr.bf16.mxu0 %v3357_v0 }
 0x15a   : > { %2051 = vmatpush1.bf16.msra.mxu1 %v3352_v1  ;;  %2157 = vmatpush1.bf16.msra.mxu0 %v3355_v2 }
 0x15b   : > { %2052 = vmatprep.subr.bf16.mxu1 %v3360_v3  ;;  %2158 = vmatprep.subr.bf16.mxu0 %v3363_v4  ;;  %v3382_v4 = vld [vmem:[#allocation4 + $0x200] ss:$16 sps:$4 sm:$0xff]  }
 0x15e   : > { %2053 = vmatpush1.bf16.msra.mxu1 %v3358_v5  ;;  %2159 = vmatpush1.bf16.msra.mxu0 %v3361_v6  ;;  %v3385_v5 = vld [vmem:[#allocation4 + $0x208] ss:$16 sps:$4 sm:$0xff]  }
 0x15f   : > { %2054 = vmatprep.subr.bf16.mxu1 %v3366_v7  ;;  %2160 = vmatprep.subr.bf16.mxu0 %v3369_v8 }
 0x162   : > { %2055 = vmatpush1.bf16.msra.mxu1 %v3364_v9  ;;  %2161 = vmatpush1.bf16.msra.mxu0 %v3367_v10  ;;  %v3390_v10 = vld [vmem:[#allocation4 + $0x224] ss:$16 sps:$4 sm:$0xff]  }
 0x163   : > { %2056 = vmatprep.subr.bf16.mxu1 %v3372_v11  ;;  %2162 = vmatprep.subr.bf16.mxu0 %v3375_v12  ;;  %v3393_v11 = vld [vmem:[#allocation4 + $0x22c] ss:$16 sps:$4 sm:$0xff]  }
 0x166   : > { %2057 = vmatpush1.bf16.msra.mxu1 %v3370_v13  ;;  %2163 = vmatpush1.bf16.msra.mxu0 %v3373_v14 }
 0x167   : > { %2058 = vmatprep.subr.bf16.mxu1 %v3378_v15  ;;  %2164 = vmatprep.subr.bf16.mxu0 %v3381_v16 }
 0x16a   : > { %2059 = vmatpush1.bf16.msra.mxu1 %v3376_v17  ;;  %2165 = vmatpush1.bf16.msra.mxu0 %v3379_v18 }
 0x16b   : > { %2081 = vmatprep.subr.bf16.mxu1 %v3384_v19  ;;  %2187 = vmatprep.subr.bf16.mxu0 %v3387_v20 }
 0x200   : > { %v1110_v31 = vpop.f32.mrb[8].mxu1  ;;  %v1163_v32 = vpop.f32.mrb[8].mxu0 }
 0x201   : > { %v1111_v33 = vadd.f32 %v1110_v31, %v739_v26  ;;  %v1164_v34 = vadd.f32 %v1163_v32, %v3810_v28  ;;  %v1112_v35 = vpop.f32.mrb[9].mxu1  ;;  %v1165_v36 = vpop.f32.mrb[9].mxu0  ;;  %v3388_v31 = vld [vmem:[#allocation4 + $0x220] ss:$16 sps:$4 sm:$0xff]  }
 0x202   : > { %v1113_v37 = vadd.f32 %v1112_v35, %v3813_v29  ;;  %v1166_v38 = vadd.f32 %v1165_v36, %v3817_v30  ;;  %v1114_v39 = vpop.f32.mrb[10].mxu1  ;;  %v1167_v40 = vpop.f32.mrb[10].mxu0 }
 0x203   : > { %vm1182_vm9 = vcmp.gt.f32.partialorder %v1111_v33, 0.0  ;;  %v1198_v41 = vmul.f32 0.01, %v1111_v33  ;;  %vm1184_vm10 = vcmp.gt.f32.partialorder %v1164_v34, 0.0  ;;  %v1200_v42 = vmul.f32 0.01, %v1164_v34 }
 0x204   : > { %vm1183_vm11 = vcmp.gt.f32.partialorder %v1113_v37, 0.0  ;;  %v1199_v43 = vmul.f32 0.01, %v1113_v37  ;;  %vm1185_vm12 = vcmp.gt.f32.partialorder %v1166_v38, 0.0  ;;  %v1201_v44 = vmul.f32 0.01, %v1166_v38 }
 0x205   : > { %v1115_v45 = vadd.f32 %v1114_v39, %v739_v26  ;;  %v1168_v46 = vadd.f32 %v1167_v40, %v3810_v28  ;;  %v1116_v47 = vpop.f32.mrb[11].mxu1  ;;  %v1169_v48 = vpop.f32.mrb[11].mxu0  ;;  %v1214_v49 = vsel %vm1182_vm9, %v1111_v33, %v1198_v41  ;;  %v1216_v50 = vsel %vm1184_vm10, %v1164_v34, %v1200_v42  ;;  %v3399_v42 = vld [vmem:[#allocation4 + $0x24c] ss:$16 sps:$4 sm:$0xff]  }
 0x206   : > { %v1117_v51 = vadd.f32 %v1116_v47, %v3813_v29  ;;  %v1170_v52 = vadd.f32 %v1169_v48, %v3817_v30  ;;  %v1215_v60 = vsel %vm1183_vm11, %v1113_v37, %v1199_v43  ;;  %v1217_v61 = vsel %vm1185_vm12, %v1166_v38, %v1201_v44  ;;  %v3394_v47 = vld [vmem:[#allocation4 + $0x240] ss:$16 sps:$4 sm:$0xff]   ;;  %v3397_v48 = vld [vmem:[#allocation4 + $0x248] ss:$16 sps:$4 sm:$0xff]  }
 0x207   : > { %vm1186_vm13 = vcmp.gt.f32.partialorder %v1115_v45, 0.0  ;;  %v1202_v53 = vmul.f32 0.01, %v1115_v45  ;;  %vm1188_vm14 = vcmp.gt.f32.partialorder %v1168_v46, 0.0  ;;  %v1204_v54 = vmul.f32 0.01, %v1168_v46 }
 0x208   : > { %vm1187_vm15 = vcmp.gt.f32.partialorder %v1117_v51, 0.0  ;;  %v1203_v55 = vmul.f32 0.01, %v1117_v51  ;;  %vm1189_vm0 = vcmp.gt.f32.partialorder %v1170_v52, 0.0  ;;  %v1205_v56 = vmul.f32 0.01, %v1170_v52 }
 0x209   : > { %v1218_v57 = vsel %vm1186_vm13, %v1115_v45, %v1202_v53  ;;  %v1220_v58 = vsel %vm1188_vm14, %v1168_v46, %v1204_v54  ;;  %v1120_v59 = vpop.f32.mrb[12].mxu1  ;;  %v1173_v62 = vpop.f32.mrb[12].mxu0 }
 0x20a   : > { %v1230_v63 = vpack.c.bf16 %v1218_v57, %v1214_v49  ;;  %v3827_v0 = vpack.c.bf16 %v1220_v58, %v1216_v50  ;;  %v1121_v1 = vadd.f32 %v1120_v59, %v739_v26  ;;  %v1122_v2 = vpop.f32.mrb[13].mxu1  ;;  %v1219_v3 = vsel %vm1187_vm15, %v1117_v51, %v1203_v55  ;;  %v1175_v6 = vpop.f32.mrb[13].mxu0  ;;  %v3403_v57 = vld [vmem:[#allocation4 + $0x268] ss:$16 sps:$4 sm:$0xff]   ;;  %v3408_v58 = vld [vmem:[#allocation4 + $0x284] ss:$16 sps:$4 sm:$0xff]  }
 0x20b   : > { %v1123_v7 = vadd.f32 %v1122_v2, %v3813_v29  ;;  %v1124_v8 = vpop.f32.mrb[14].mxu1  ;;  %v1231_v9 = vpack.c.bf16 %v1219_v3, %v1215_v60  ;;  %v1221_v12 = vsel %vm1189_vm0, %v1170_v52, %v1205_v56  ;;  %v1174_v13 = vadd.f32 %v1173_v62, %v3810_v28  ;;  %v1177_v14 = vpop.f32.mrb[14].mxu0  ;;  %v3405_v52 = vld [vmem:[#allocation4 + $0x26c] ss:$16 sps:$4 sm:$0xff]   ;;  %v3400_v56 = vld [vmem:[#allocation4 + $0x260] ss:$16 sps:$4 sm:$0xff]  }
 0x20c   : > { %vm1190_vm1 = vcmp.gt.f32.partialorder %v1121_v1, 0.0  ;;  %v1206_v15 = vmul.f32 0.01, %v1121_v1  ;;  %v1125_v16 = vadd.f32 %v1124_v8, %v739_v26  ;;  %v1126_v17 = vpop.f32.mrb[15].mxu1  ;;  %v1233_v18 = vpack.c.bf16 %v1221_v12, %v1217_v61  ;;  %v1179_v19 = vpop.f32.mrb[15].mxu0 }
 0x20d   : > { %vm1191_vm2 = vcmp.gt.f32.partialorder %v1123_v7, 0.0  ;;  %v1207_v20 = vmul.f32 0.01, %v1123_v7  ;;  %v1127_v22 = vadd.f32 %v1126_v17, %v3813_v29  ;;  %2060 = vmatprep.mubr.bf16.mxu1 %v1231_v9  ;;  %2166 = vmatprep.mubr.bf16.mxu0 %v1231_v9  ;;  %v1208_v34 = vmul.f32 0.01, %v1174_v13 }
 0x20e   : > { %vm1194_vm3 = vcmp.gt.f32.partialorder %v1125_v16, 0.0  ;;  %v1210_v32 = vmul.f32 0.01, %v1125_v16  ;;  %2061 = vmatmul.mubr.bf16.vlgmr.msra.gmra.mrb[16].mxu1 %v1230_v63  ;;  %2167 = vmatmul.mubr.bf16.vlgmr.msra.gmra.mrb[16].mxu0 %v1230_v63  ;;  %v1222_v33 = vsel %vm1190_vm1, %v1121_v1, %v1206_v15  ;;  %v3391_v26 = vld [vmem:[#allocation4 + $0x228] ss:$16 sps:$4 sm:$0xff]   ;;  %v1176_v37 = vadd.f32 %v1175_v6, %v3817_v30 }
 0x20f   : > { %vm1195_vm4 = vcmp.gt.f32.partialorder %v1127_v22, 0.0  ;;  %v1211_v35 = vmul.f32 0.01, %v1127_v22  ;;  %2082 = vmatpush1.bf16.msra.mxu1 %v3382_v4  ;;  %2188 = vmatpush1.bf16.msra.mxu0 %v3385_v5  ;;  %v1223_v36 = vsel %vm1191_vm2, %v1123_v7, %v1207_v20  ;;  %v3396_v29 = vld [vmem:[#allocation4 + $0x244] ss:$16 sps:$4 sm:$0xff]   ;;  %vm1192_vm5 = vcmp.gt.f32.partialorder %v1174_v13, 0.0 }
 0x210   : > { %2083 = vmatprep.subr.bf16.mxu1 %v3390_v10  ;;  %2189 = vmatprep.subr.bf16.mxu0 %v3393_v11  ;;  %v1226_v38 = vsel %vm1194_vm3, %v1125_v16, %v1210_v32  ;;  %v1178_v39 = vadd.f32 %v1177_v14, %v3810_v28  ;;  %v1180_v40 = vadd.f32 %v1179_v19, %v3817_v30  ;;  %vm1193_vm6 = vcmp.gt.f32.partialorder %v1176_v37, 0.0  ;;  %v3402_v30 = vld [vmem:[#allocation4 + $0x264] ss:$16 sps:$4 sm:$0xff]   ;;  %v3411_v59 = vld [vmem:[#allocation4 + $0x28c] ss:$16 sps:$4 sm:$0xff]  }
 0x211   : > { %v1227_v41 = vsel %vm1195_vm4, %v1127_v22, %v1211_v35  ;;  %v1234_v43 = vpack.c.bf16 %v1226_v38, %v1222_v33  ;;  %v1209_v44 = vmul.f32 0.01, %v1176_v37  ;;  %v1224_v51 = vsel %vm1192_vm5, %v1174_v13, %v1208_v34  ;;  %v3406_v60 = vld [vmem:[#allocation4 + $0x280] ss:$16 sps:$4 sm:$0xff]   ;;  %v3409_v61 = vld [vmem:[#allocation4 + $0x288] ss:$16 sps:$4 sm:$0xff]  }
 0x212   : > { %v1235_v45 = vpack.c.bf16 %v1227_v41, %v1223_v36  ;;  %vm1196_vm7 = vcmp.gt.f32.partialorder %v1178_v39, 0.0  ;;  %v1212_v46 = vmul.f32 0.01, %v1178_v39  ;;  %vm1197_vm8 = vcmp.gt.f32.partialorder %v1180_v40, 0.0  ;;  %v3414_v62 = vld [vmem:[#allocation4 + $0x2a4] ss:$16 sps:$4 sm:$0xff]  }
 0x213   : > { %2084 = vmatpush1.bf16.msra.mxu1 %v3388_v31  ;;  %2190 = vmatpush1.bf16.msra.mxu0 %v3391_v26  ;;  %v1213_v49 = vmul.f32 0.01, %v1180_v40  ;;  %v1225_v50 = vsel %vm1193_vm6, %v1176_v37, %v1209_v44  ;;  %v3417_v63 = vld [vmem:[#allocation4 + $0x2ac] ss:$16 sps:$4 sm:$0xff]   ;;  %v3412_v1 = vld [vmem:[#allocation4 + $0x2a0] ss:$16 sps:$4 sm:$0xff]  }
 0x214   : > { %2070 = vmatprep.mubr.bf16.mxu1 %v1235_v45  ;;  %2085 = vmatprep.subr.bf16.mxu1 %v3396_v29  ;;  %v1228_v28 = vsel %vm1196_vm7, %v1178_v39, %v1212_v46  ;;  %v3415_v2 = vld [vmem:[#allocation4 + $0x2a8] ss:$16 sps:$4 sm:$0xff]   ;;  %v3420_v3 = vld [vmem:[#allocation4 + $0x2c4] ss:$16 sps:$4 sm:$0xff]   ;;  %v3423_v4 = vld [vmem:[#allocation4 + $0x2cc] ss:$16 sps:$4 sm:$0xff]  }
 0x215   : > { %2176 = vmatprep.mubr.bf16.mxu0 %v1235_v45  ;;  %2191 = vmatprep.subr.bf16.mxu0 %v3399_v42  ;;  %v1229_v53 = vsel %vm1197_vm8, %v1180_v40, %v1213_v49  ;;  %v3840_v54 = vpack.c.bf16 %v1228_v28, %v1224_v51  ;;  %v3418_v5 = vld [vmem:[#allocation4 + $0x2c0] ss:$16 sps:$4 sm:$0xff]   ;;  %v3421_v6 = vld [vmem:[#allocation4 + $0x2c8] ss:$16 sps:$4 sm:$0xff]   ;;  %v3426_v7 = vld [vmem:[#allocation4 + $0x2e4] ss:$16 sps:$4 sm:$0xff]  }
 0x216   : > { %2071 = vmatmul.mubr.bf16.gmra.mrb[20].mxu1 %v1234_v43  ;;  %2177 = vmatmul.mubr.bf16.gmra.mrb[20].mxu0 %v1234_v43  ;;  %v3842_v55 = vpack.c.bf16 %v1229_v53, %v1225_v50  ;;  %v3429_v8 = vld [vmem:[#allocation4 + $0x2ec] ss:$16 sps:$4 sm:$0xff]   ;;  %v3424_v9 = vld [vmem:[#allocation4 + $0x2e0] ss:$16 sps:$4 sm:$0xff]   ;;  %v3427_v10 = vld [vmem:[#allocation4 + $0x2e8] ss:$16 sps:$4 sm:$0xff]  }
 0x217   : > { %2086 = vmatpush1.bf16.msra.mxu1 %v3394_v47  ;;  %2192 = vmatpush1.bf16.msra.mxu0 %v3397_v48  ;;  %v3432_v11 = vld [vmem:[#allocation4 + $0x304] ss:$16 sps:$4 sm:$0xff]   ;;  %v3435_v12 = vld [vmem:[#allocation4 + $0x30c] ss:$16 sps:$4 sm:$0xff]   ;;  %v3430_v13 = vld [vmem:[#allocation4 + $0x300] ss:$16 sps:$4 sm:$0xff]  }
 0x218   : > { %2113 = vmatprep.mubr.bf16.mxu1 %v1233_v18  ;;  %2219 = vmatprep.mubr.bf16.mxu0 %v1233_v18  ;;  %v3433_v14 = vld [vmem:[#allocation4 + $0x308] ss:$16 sps:$4 sm:$0xff]   ;;  %v3438_v15 = vld [vmem:[#allocation4 + $0x324] ss:$16 sps:$4 sm:$0xff]   ;;  %v3441_v16 = vld [vmem:[#allocation4 + $0x32c] ss:$16 sps:$4 sm:$0xff]  }
 0x219   : > { %2087 = vmatprep.subr.bf16.mxu1 %v3402_v30  ;;  %2193 = vmatprep.subr.bf16.mxu0 %v3405_v52  ;;  %v3436_v17 = vld [vmem:[#allocation4 + $0x320] ss:$16 sps:$4 sm:$0xff]   ;;  %v3439_v18 = vld [vmem:[#allocation4 + $0x328] ss:$16 sps:$4 sm:$0xff]   ;;  %v3444_v19 = vld [vmem:[#allocation4 + $0x344] ss:$16 sps:$4 sm:$0xff]  }
 0x21a   : > { %v3447_v20 = vld [vmem:[#allocation4 + $0x34c] ss:$16 sps:$4 sm:$0xff]   ;;  %v3442_v22 = vld [vmem:[#allocation4 + $0x340] ss:$16 sps:$4 sm:$0xff]   ;;  %v3445_v31 = vld [vmem:[#allocation4 + $0x348] ss:$16 sps:$4 sm:$0xff]  }
 0x21b   : > { %2088 = vmatpush1.bf16.msra.mxu1 %v3400_v56  ;;  %2194 = vmatpush1.bf16.msra.mxu0 %v3403_v57  ;;  %v3450_v32 = vld [vmem:[#allocation4 + $0x364] ss:$16 sps:$4 sm:$0xff]   ;;  %v3453_v33 = vld [vmem:[#allocation4 + $0x36c] ss:$16 sps:$4 sm:$0xff]   ;;  %v3448_v34 = vld [vmem:[#allocation4 + $0x360] ss:$16 sps:$4 sm:$0xff]  }
 0x21c   : > { %2089 = vmatprep.subr.bf16.mxu1 %v3408_v58  ;;  %2195 = vmatprep.subr.bf16.mxu0 %v3411_v59  ;;  %v3451_v35 = vld [vmem:[#allocation4 + $0x368] ss:$16 sps:$4 sm:$0xff]   ;;  %v3456_v26 = vld [vmem:[#allocation4 + $0x384] ss:$16 sps:$4 sm:$0xff]   ;;  %v3459_v36 = vld [vmem:[#allocation4 + $0x38c] ss:$16 sps:$4 sm:$0xff]  }
 0x21d   : > { %v3454_v37 = vld [vmem:[#allocation4 + $0x380] ss:$16 sps:$4 sm:$0xff]   ;;  %v3457_v29 = vld [vmem:[#allocation4 + $0x388] ss:$16 sps:$4 sm:$0xff]   ;;  %v3462_v38 = vld [vmem:[#allocation4 + $0x3a4] ss:$16 sps:$4 sm:$0xff]  }
 0x21e   : > { %v3465_v39 = vld [vmem:[#allocation4 + $0x3ac] ss:$16 sps:$4 sm:$0xff]   ;;  %v3460_v40 = vld [vmem:[#allocation4 + $0x3a0] ss:$16 sps:$4 sm:$0xff]   ;;  %v3463_v41 = vld [vmem:[#allocation4 + $0x3a8] ss:$16 sps:$4 sm:$0xff]  }
 0x21f   : > { %2090 = vmatpush1.bf16.msra.mxu1 %v3406_v60  ;;  %2196 = vmatpush1.bf16.msra.mxu0 %v3409_v61  ;;  %v3468_v42 = vld [vmem:[#allocation4 + $0x3c4] ss:$16 sps:$4 sm:$0xff]   ;;  %v3471_v43 = vld [vmem:[#allocation4 + $0x3cc] ss:$16 sps:$4 sm:$0xff]   ;;  %v3466_v44 = vld [vmem:[#allocation4 + $0x3c0] ss:$16 sps:$4 sm:$0xff]  }
 0x220   : > { %2091 = vmatprep.subr.bf16.mxu1 %v3414_v62  ;;  %2197 = vmatprep.subr.bf16.mxu0 %v3417_v63  ;;  %v3469_v45 = vld [vmem:[#allocation4 + $0x3c8] ss:$16 sps:$4 sm:$0xff]   ;;  %v3474_v46 = vld [vmem:[#allocation4 + $0x3e4] ss:$16 sps:$4 sm:$0xff]   ;;  %v3477_v47 = vld [vmem:[#allocation4 + $0x3ec] ss:$16 sps:$4 sm:$0xff]  }
 0x221   : > { %v3472_v48 = vld [vmem:[#allocation4 + $0x3e0] ss:$16 sps:$4 sm:$0xff]   ;;  %v3475_v49 = vld [vmem:[#allocation4 + $0x3e8] ss:$16 sps:$4 sm:$0xff]  }
 0x222   : > { %v3478_v50 = vld [vmem:[%s4016_s9 + $0x40] sm:$0xff]   ;;  %v3482_v52 = vld [vmem:[%s4016_s9 + $0x48] sm:$0xff]   ;;  %v3488_v58 = vld [vmem:[%s4016_s9 + $0x10] sm:$0xff]  }
 0x223   : > { %2092 = vmatpush1.bf16.msra.mxu1 %v3412_v1  ;;  %2198 = vmatpush1.bf16.msra.mxu0 %v3415_v2  ;;  %v3479_v51 = vld [vmem:[%s4016_s9 + $0xc0] sm:$0xff]   ;;  %v3483_v53 = vld [vmem:[%s4016_s9 + $0xc8] sm:$0xff]   ;;  %v3489_v59 = vld [vmem:[%s4016_s9 + $0x90] sm:$0xff]  }
 0x224   : > { %2093 = vmatprep.subr.bf16.mxu1 %v3420_v3  ;;  %2199 = vmatprep.subr.bf16.mxu0 %v3423_v4  ;;  %v3480_v28 = vld [vmem:[%s4016_s9] sm:$0xff]   ;;  %v3484_v56 = vld [vmem:[%s4016_s9 + $0x8] sm:$0xff]   ;;  %v3490_v60 = vld [vmem:[%s4016_s9 + $0x58] sm:$0xff]  }
 0x225   : > { %v3481_v30 = vld [vmem:[%s4016_s9 + $0x80] sm:$0xff]   ;;  %v3485_v57 = vld [vmem:[%s4016_s9 + $0x88] sm:$0xff]   ;;  %v3491_v61 = vld [vmem:[%s4016_s9 + $0xd8] sm:$0xff]  }
 0x226   : > { %v3492_v62 = vld [vmem:[%s4016_s9 + $0x18] sm:$0xff]   ;;  %v3494_v1 = vld [vmem:[%s4016_s9 + $0x60] sm:$0xff]   ;;  %v3498_v4 = vld [vmem:[%s4016_s9 + $0x68] sm:$0xff]  }
 0x227   : > { %2094 = vmatpush1.bf16.msra.mxu1 %v3418_v5  ;;  %2200 = vmatpush1.bf16.msra.mxu0 %v3421_v6  ;;  %v3493_v63 = vld [vmem:[%s4016_s9 + $0x98] sm:$0xff]   ;;  %v3496_v2 = vld [vmem:[%s4016_s9 + $0x20] sm:$0xff]   ;;  %v3499_v5 = vld [vmem:[%s4016_s9 + $0xe8] sm:$0xff]  }
 0x228   : > { %2095 = vmatprep.subr.bf16.mxu1 %v3426_v7  ;;  %2201 = vmatprep.subr.bf16.mxu0 %v3429_v8  ;;  %v3497_v3 = vld [vmem:[%s4016_s9 + $0xa0] sm:$0xff]   ;;  %v3500_v6 = vld [vmem:[%s4016_s9 + $0x28] sm:$0xff]   ;;  %v3502_v8 = vld [vmem:[%s4016_s9 + $0x70] sm:$0xff]  }
 0x229   : > { %v3501_v7 = vld [vmem:[%s4016_s9 + $0xa8] sm:$0xff]  }
 0x22b   : > { %2096 = vmatpush1.bf16.msra.mxu1 %v3424_v9  ;;  %2202 = vmatpush1.bf16.msra.mxu0 %v3427_v10  ;;  %v3503_v9 = vld [vmem:[%s4016_s9 + $0xf0] sm:$0xff]  }
 0x22c   : > { %2097 = vmatprep.subr.bf16.mxu1 %v3432_v11  ;;  %2203 = vmatprep.subr.bf16.mxu0 %v3435_v12  ;;  %v3504_v10 = vld [vmem:[%s4016_s9 + $0x30] sm:$0xff]   ;;  %v3506_v12 = vld [vmem:[%s4016_s9 + $0x78] sm:$0xff]  }
 0x22d   : > { %v3505_v11 = vld [vmem:[%s4016_s9 + $0xb0] sm:$0xff]  }
 0x22f   : > { %2098 = vmatpush1.bf16.msra.mxu1 %v3430_v13  ;;  %2204 = vmatpush1.bf16.msra.mxu0 %v3433_v14  ;;  %v3507_v13 = vld [vmem:[%s4016_s9 + $0xf8] sm:$0xff]  }
 0x230   : > { %2099 = vmatprep.subr.bf16.mxu1 %v3438_v15  ;;  %2205 = vmatprep.subr.bf16.mxu0 %v3441_v16  ;;  %v3508_v14 = vld [vmem:[%s4016_s9 + $0x38] sm:$0xff]   ;;  %v1366_v16 = vld [vmem:[%s4015_s8] sm:$0xf] }
 0x231   : > { %v3509_v15 = vld [vmem:[%s4016_s9 + $0xb8] sm:$0xff]  }
 0x233   : > { %2100 = vmatpush1.bf16.msra.mxu1 %v3436_v17  ;;  %2206 = vmatpush1.bf16.msra.mxu0 %v3439_v18  ;;  %v3950_v17 = vrot.slane %v1366_v16, %v3791_v25  ;;  %v3954_v18 = vrot.slane %v1366_v16, %v746_v21 }
 0x234   : > { %2101 = vmatprep.subr.bf16.mxu1 %v3444_v19  ;;  %2207 = vmatprep.subr.bf16.mxu0 %v3447_v20  ;;  %v3957_v19 = vrot.slane %v1366_v16, %v3797_v27  ;;  %v3961_v20 = vrot.slane %v1366_v16, %v750_v23 }
 0x237   : > { %2102 = vmatpush1.bf16.msra.mxu1 %v3442_v22  ;;  %2208 = vmatpush1.bf16.msra.mxu0 %v3445_v31 }
 0x238   : > { %2103 = vmatprep.subr.bf16.mxu1 %v3450_v32  ;;  %2209 = vmatprep.subr.bf16.mxu0 %v3453_v33 }
 0x23b   : > { %2104 = vmatpush1.bf16.msra.mxu1 %v3448_v34  ;;  %2210 = vmatpush1.bf16.msra.mxu0 %v3451_v35 }
 0x23c   : > { %2105 = vmatprep.subr.bf16.mxu1 %v3456_v26  ;;  %2211 = vmatprep.subr.bf16.mxu0 %v3459_v36 }
 0x23f   : > { %2106 = vmatpush1.bf16.msra.mxu1 %v3454_v37  ;;  %2212 = vmatpush1.bf16.msra.mxu0 %v3457_v29 }
 0x240   : > { %2107 = vmatprep.subr.bf16.mxu1 %v3462_v38  ;;  %2213 = vmatprep.subr.bf16.mxu0 %v3465_v39 }
 0x243   : > { %2108 = vmatpush1.bf16.msra.mxu1 %v3460_v40  ;;  %2214 = vmatpush1.bf16.msra.mxu0 %v3463_v41 }
 0x244   : > { %2109 = vmatprep.subr.bf16.mxu1 %v3468_v42  ;;  %2215 = vmatprep.subr.bf16.mxu0 %v3471_v43 }
 0x247   : > { %2110 = vmatpush1.bf16.msra.mxu1 %v3466_v44  ;;  %2216 = vmatpush1.bf16.msra.mxu0 %v3469_v45 }
 0x248   : > { %2111 = vmatprep.subr.bf16.mxu1 %v3474_v46  ;;  %2217 = vmatprep.subr.bf16.mxu0 %v3477_v47 }
 0x24b   : > { %2112 = vmatpush1.bf16.msra.mxu1 %v3472_v48  ;;  %2218 = vmatpush1.bf16.msra.mxu0 %v3475_v49 }
 0x24c   : > { %3050 = vmatprep.subr.bf16.mxu1 %v3478_v50  ;;  %3078 = vmatprep.subr.bf16.mxu0 %v3479_v51 }
 0x24e   : > { %2114 = vmatmul.mubr.bf16.vlgmr.msra.gmra.mrb[16].mxu1 %v3827_v0  ;;  %2220 = vmatmul.mubr.bf16.vlgmr.msra.gmra.mrb[16].mxu0 %v3827_v0  ;;  %v3486_v0 = vld [vmem:[%s4016_s9 + $0x50] sm:$0xff]  }
 0x24f   : > { %2123 = vmatprep.mubr.bf16.mxu1 %v3842_v55  ;;  %2229 = vmatprep.mubr.bf16.mxu0 %v3842_v55  ;;  %v3487_v55 = vld [vmem:[%s4016_s9 + $0xd0] sm:$0xff]  }
 0x250   : > { %3051 = vmatpush3.bf16.msra.mxu1 %v3480_v28  ;;  %3079 = vmatpush3.bf16.msra.mxu0 %v3481_v30 }
 0x251   : > { %3052 = vmatprep.subr.bf16.mxu1 %v3482_v52  ;;  %3080 = vmatprep.subr.bf16.mxu0 %v3483_v53 }
 0x254   : > { %3053 = vmatpush3.bf16.msra.mxu1 %v3484_v56  ;;  %3081 = vmatpush3.bf16.msra.mxu0 %v3485_v57 }
 0x255   : > { %3054 = vmatprep.subr.bf16.mxu1 %v3486_v0  ;;  %3082 = vmatprep.subr.bf16.mxu0 %v3487_v55 }
 0x256   : > { %2124 = vmatmul.mubr.bf16.gmra.mrb[20].mxu1 %v3840_v54  ;;  %2230 = vmatmul.mubr.bf16.gmra.mrb[20].mxu0 %v3840_v54  ;;  %v3495_v54 = vld [vmem:[%s4016_s9 + $0xe0] sm:$0xff]  }
 0x258   : > { %3055 = vmatpush3.bf16.msra.mxu1 %v3488_v58  ;;  %3083 = vmatpush3.bf16.msra.mxu0 %v3489_v59 }
 0x259   : > { %3056 = vmatprep.subr.bf16.mxu1 %v3490_v60  ;;  %3084 = vmatprep.subr.bf16.mxu0 %v3491_v61 }
 0x25c   : > { %3057 = vmatpush3.bf16.msra.mxu1 %v3492_v62  ;;  %3085 = vmatpush3.bf16.msra.mxu0 %v3493_v63 }
 0x25d   : > { %3058 = vmatprep.subr.bf16.mxu1 %v3494_v1  ;;  %3086 = vmatprep.subr.bf16.mxu0 %v3495_v54 }
 0x260   : > { %3059 = vmatpush3.bf16.msra.mxu1 %v3496_v2  ;;  %3087 = vmatpush3.bf16.msra.mxu0 %v3497_v3 }
 0x261   : > { %3060 = vmatprep.subr.bf16.mxu1 %v3498_v4  ;;  %3088 = vmatprep.subr.bf16.mxu0 %v3499_v5 }
 0x264   : > { %3061 = vmatpush3.bf16.msra.mxu1 %v3500_v6  ;;  %3089 = vmatpush3.bf16.msra.mxu0 %v3501_v7 }
 0x265   : > { %3062 = vmatprep.subr.bf16.mxu1 %v3502_v8  ;;  %3090 = vmatprep.subr.bf16.mxu0 %v3503_v9 }
 0x268   : > { %3063 = vmatpush3.bf16.msra.mxu1 %v3504_v10  ;;  %3091 = vmatpush3.bf16.msra.mxu0 %v3505_v11 }
 0x269   : > { %3064 = vmatprep.subr.bf16.mxu1 %v3506_v12  ;;  %3092 = vmatprep.subr.bf16.mxu0 %v3507_v13 }
 0x26c   : > { %3065 = vmatpush3.bf16.msra.mxu1 %v3508_v14  ;;  %3093 = vmatpush3.bf16.msra.mxu0 %v3509_v15 }
 0x321   : > { %v2115_v22 = vpop.f32.mrb[16].mxu1  ;;  %v2221_v31 = vpop.f32.mrb[16].mxu0 }
 0x322   : > { %v3114_v32 = vadd.f32 %v2115_v22, %v3950_v17  ;;  %v3122_v33 = vadd.f32 %v2221_v31, %v3954_v18  ;;  %v2117_v34 = vpop.f32.mrb[17].mxu1  ;;  %v2223_v25 = vpop.f32.mrb[17].mxu0 }
 0x323   : > { %v3115_v35 = vadd.f32 %v2117_v34, %v3957_v19  ;;  %v3123_v21 = vadd.f32 %v2223_v25, %v3961_v20  ;;  %v2119_v26 = vpop.f32.mrb[18].mxu1  ;;  %v2225_v36 = vpop.f32.mrb[18].mxu0 }
 0x324   : > { %vm2240_vm9 = vcmp.gt.f32.partialorder %v3114_v32, 0.0  ;;  %v2256_v27 = vmul.f32 0.01, %v3114_v32  ;;  %vm2242_vm10 = vcmp.gt.f32.partialorder %v3122_v33, 0.0  ;;  %v2258_v24 = vmul.f32 0.01, %v3122_v33 }
 0x325   : > { %vm2241_vm11 = vcmp.gt.f32.partialorder %v3115_v35, 0.0  ;;  %v2257_v23 = vmul.f32 0.01, %v3115_v35  ;;  %vm2243_vm12 = vcmp.gt.f32.partialorder %v3123_v21, 0.0  ;;  %v2259_v37 = vmul.f32 0.01, %v3123_v21 }
 0x326   : > { %v3116_v29 = vadd.f32 %v2119_v26, %v3950_v17  ;;  %v3124_v38 = vadd.f32 %v2225_v36, %v3954_v18  ;;  %v2121_v39 = vpop.f32.mrb[19].mxu1  ;;  %v2227_v40 = vpop.f32.mrb[19].mxu0  ;;  %v2272_v41 = vsel %vm2240_vm9, %v3114_v32, %v2256_v27  ;;  %v2274_v42 = vsel %vm2242_vm10, %v3122_v33, %v2258_v24  ;;  %v3015_v27 = vld [vmem:[%s4017_s10] ss:$0 sm:$0xff] }
 0x327   : > { %v3117_v43 = vadd.f32 %v2121_v39, %v3957_v19  ;;  %v3125_v44 = vadd.f32 %v2227_v40, %v3961_v20  ;;  %v2273_v30 = vsel %vm2241_vm11, %v3115_v35, %v2257_v23  ;;  %v2275_v52 = vsel %vm2243_vm12, %v3123_v21, %v2259_v37 }
 0x328   : > { %vm2244_vm13 = vcmp.gt.f32.partialorder %v3116_v29, 0.0  ;;  %v2260_v45 = vmul.f32 0.01, %v3116_v29  ;;  %vm2246_vm14 = vcmp.gt.f32.partialorder %v3124_v38, 0.0  ;;  %v2262_v46 = vmul.f32 0.01, %v3124_v38 }
 0x329   : > { %vm2245_vm15 = vcmp.gt.f32.partialorder %v3117_v43, 0.0  ;;  %v2261_v47 = vmul.f32 0.01, %v3117_v43  ;;  %vm2247_vm0 = vcmp.gt.f32.partialorder %v3125_v44, 0.0  ;;  %v2263_v48 = vmul.f32 0.01, %v3125_v44 }
 0x32a   : > { %v2276_v49 = vsel %vm2244_vm13, %v3116_v29, %v2260_v45  ;;  %v2278_v50 = vsel %vm2246_vm14, %v3124_v38, %v2262_v46  ;;  %v2125_v51 = vpop.f32.mrb[20].mxu1  ;;  %v2231_v28 = vpop.f32.mrb[20].mxu0  ;;  %vm2657_vm9 = vcmask 31744  }
 0x32b   : > { %v2288_v53 = vpack.c.bf16 %v2276_v49, %v2272_v41  ;;  %v2290_v56 = vpack.c.bf16 %v2278_v50, %v2274_v42  ;;  %v3118_v57 = vadd.f32 %v2125_v51, %v3950_v17  ;;  %v3126_v0 = vadd.f32 %v2231_v28, %v3954_v18  ;;  %v2127_v55 = vpop.f32.mrb[21].mxu1  ;;  %v2233_v58 = vpop.f32.mrb[21].mxu0 }
 0x32c   : > { %v3119_v59 = vadd.f32 %v2127_v55, %v3957_v19  ;;  %v3127_v60 = vadd.f32 %v2233_v58, %v3961_v20  ;;  %v2129_v61 = vpop.f32.mrb[22].mxu1  ;;  %v2235_v62 = vpop.f32.mrb[22].mxu0  ;;  %v2277_v63 = vsel %vm2245_vm15, %v3117_v43, %v2261_v47  ;;  %v2279_v1 = vsel %vm2247_vm0, %v3125_v44, %v2263_v48 }
 0x32d   : > { %vm2248_vm1 = vcmp.gt.f32.partialorder %v3118_v57, 0.0  ;;  %v2264_v54 = vmul.f32 0.01, %v3118_v57  ;;  %vm2250_vm2 = vcmp.gt.f32.partialorder %v3126_v0, 0.0  ;;  %v2266_v2 = vmul.f32 0.01, %v3126_v0 }
 0x32e   : > { %vm2249_vm3 = vcmp.gt.f32.partialorder %v3119_v59, 0.0  ;;  %v2265_v3 = vmul.f32 0.01, %v3119_v59  ;;  %vm2251_vm4 = vcmp.gt.f32.partialorder %v3127_v60, 0.0  ;;  %v2267_v4 = vmul.f32 0.01, %v3127_v60 }
 0x32f   : > { %v3120_v5 = vadd.f32 %v2129_v61, %v3950_v17  ;;  %v3128_v6 = vadd.f32 %v2235_v62, %v3954_v18  ;;  %v2131_v7 = vpop.f32.mrb[23].mxu1  ;;  %v2237_v8 = vpop.f32.mrb[23].mxu0  ;;  %v2289_v9 = vpack.c.bf16 %v2277_v63, %v2273_v30  ;;  %v2291_v10 = vpack.c.bf16 %v2279_v1, %v2275_v52 }
 0x330   : > { %v3121_v11 = vadd.f32 %v2131_v7, %v3957_v19  ;;  %v3129_v12 = vadd.f32 %v2237_v8, %v3961_v20  ;;  %v2281_v13 = vsel %vm2249_vm3, %v3119_v59, %v2265_v3  ;;  %v2283_v14 = vsel %vm2251_vm4, %v3127_v60, %v2267_v4 }
 0x331   : > { %vm2252_vm5 = vcmp.gt.f32.partialorder %v3120_v5, 0.0  ;;  %v2268_v15 = vmul.f32 0.01, %v3120_v5  ;;  %vm2254_vm6 = vcmp.gt.f32.partialorder %v3128_v6, 0.0  ;;  %v2270_v16 = vmul.f32 0.01, %v3128_v6  ;;  %2591 = vmatprep.mubr.bf16.mxu1 %v2289_v9  ;;  %2640 = vmatprep.mubr.bf16.mxu0 %v2291_v10 }
 0x332   : > { %vm2253_vm7 = vcmp.gt.f32.partialorder %v3121_v11, 0.0  ;;  %v2269_v17 = vmul.f32 0.01, %v3121_v11  ;;  %vm2255_vm8 = vcmp.gt.f32.partialorder %v3129_v12, 0.0  ;;  %v2271_v18 = vmul.f32 0.01, %v3129_v12  ;;  %2592 = vmatmul.mubr.bf16.vlgmr.msra.gmra.mrb[24].mxu1 %v2288_v53  ;;  %2641 = vmatmul.mubr.bf16.vlgmr.msra.gmra.mrb[24].mxu0 %v2290_v56 }
 0x333   : > { %v2280_v22 = vsel %vm2248_vm1, %v3118_v57, %v2264_v54  ;;  %v2284_v31 = vsel %vm2252_vm5, %v3120_v5, %v2268_v15  ;;  %v2282_v19 = vsel %vm2250_vm2, %v3126_v0, %v2266_v2  ;;  %v2286_v20 = vsel %vm2254_vm6, %v3128_v6, %v2270_v16 }
 0x334   : > { %v2285_v32 = vsel %vm2253_vm7, %v3121_v11, %v2269_v17  ;;  %v2287_v33 = vsel %vm2255_vm8, %v3129_v12, %v2271_v18  ;;  %v2292_v34 = vpack.c.bf16 %v2284_v31, %v2280_v22  ;;  %v2294_v25 = vpack.c.bf16 %v2286_v20, %v2282_v19 }
 0x335   : > { %v2293_v35 = vpack.c.bf16 %v2285_v32, %v2281_v13  ;;  %v2295_v21 = vpack.c.bf16 %v2287_v33, %v2283_v14 }
 0x337   : > { %2599 = vmatprep.mubr.bf16.mxu1 %v2293_v35  ;;  %2648 = vmatprep.mubr.bf16.mxu0 %v2295_v21 }
 0x33a   : > { %2600 = vmatmul.mubr.bf16.gmra.mrb[28].mxu1 %v2292_v34  ;;  %2649 = vmatmul.mubr.bf16.gmra.mrb[28].mxu0 %v2294_v25 }
 0x405   : > { %v3066_v26 = vpop.f32.mrb[24].mxu1  ;;  %v3094_v36 = vpop.f32.mrb[24].mxu0 }
 0x406   : > { %v3067_v24 = vpop.f32.mrb[25].mxu1  ;;  %v3095_v23 = vpop.f32.mrb[25].mxu0 }
 0x407   : > { %v3068_v37 = vadd.f32 %v3067_v24, %v3066_v26  ;;  %v3096_v29 = vadd.f32 %v3095_v23, %v3094_v36  ;;  %v3069_v38 = vpop.f32.mrb[26].mxu1  ;;  %v3097_v39 = vpop.f32.mrb[26].mxu0 }
 0x408   : > { %v3070_v40 = vpop.f32.mrb[27].mxu1  ;;  %v3098_v41 = vpop.f32.mrb[27].mxu0 }
 0x409   : > { %v2594_v42 = vadd.f32 %v3068_v37, %v3015_v27  ;;  %v3071_v43 = vadd.f32 %v3070_v40, %v3069_v38  ;;  %v3099_v44 = vadd.f32 %v3098_v41, %v3097_v39 }
 0x40b   : > { %v2597_v45 = vadd.f32 %v3071_v43, %v3015_v27  ;;  %v2643_v46 = vadd.f32 %v3096_v29, %v2594_v42 }
 0x40d   : > { %v3072_v47 = vpop.f32.mrb[28].mxu1  ;;  %v3100_v48 = vpop.f32.mrb[28].mxu0  ;;  %v2658_v49 = vsel %vm2657_vm9, %v2643_v46, -inf  ;;  %v2646_v50 = vadd.f32 %v3099_v44, %v2597_v45 }
 0x40e   : > { %v3073_v51 = vpop.f32.mrb[29].mxu1  ;;  %v3101_v28 = vpop.f32.mrb[29].mxu0  ;;  %2659 = vmax.xlane.f32.xlu0 %v2658_v49 }
 0x40f   : > { %v3074_v30 = vadd.f32 %v3073_v51, %v3072_v47  ;;  %v3102_v52 = vadd.f32 %v3101_v28, %v3100_v48  ;;  %v3075_v53 = vpop.f32.mrb[30].mxu1  ;;  %v3103_v56 = vpop.f32.mrb[30].mxu0  ;;  %v2661_v60 = vsel %vm2657_vm9, %v2646_v50, -inf }
 0x410   : > { %v3076_v57 = vpop.f32.mrb[31].mxu1  ;;  %v3104_v0 = vpop.f32.mrb[31].mxu0 }
 0x411   : > { %v2602_v55 = vadd.f32 %v3074_v30, %v3015_v27  ;;  %v3077_v58 = vadd.f32 %v3076_v57, %v3075_v53  ;;  %v3105_v59 = vadd.f32 %v3104_v0, %v3103_v56 }
 0x412   : > { %2662 = vmax.xlane.f32.xlu0 %v2661_v60 }
 0x413   : > { %v2605_v61 = vadd.f32 %v3077_v58, %v3015_v27  ;;  %v2651_v62 = vadd.f32 %v3102_v52, %v2602_v55 }
 0x415   : > { %v2664_v63 = vsel %vm2657_vm9, %v2651_v62, -inf  ;;  %v2654_v1 = vadd.f32 %v3105_v59, %v2605_v61 }
 0x416   : > { %2665 = vmax.xlane.f32.xlu1 %v2664_v63 }
 0x417   : > { %v2667_v54 = vsel %vm2657_vm9, %v2654_v1, -inf }
 0x41a   : > { %2668 = vmax.xlane.f32.xlu1 %v2667_v54 }
 0x49b   : > { %v2660_v2 = vpop.xlane.xlu0 %2659 }
 0x49c   : > { %v2670_v3 = vsub.f32 %v2643_v46, %v2660_v2 }
 0x49e   : > { %v2674_v4 = vmul.f32 1.442695, %v2670_v3 }
 0x49f   : > { %v2663_v5 = vpop.xlane.xlu0 %2662 }
 0x4a0   : > { %3510 = vpow2.f32 %v2674_v4  ;;  %v2671_v6 = vsub.f32 %v2646_v50, %v2663_v5 }
 0x4a2   : > { %v2676_v7 = vmul.f32 1.442695, %v2671_v6 }
 0x4a3   : > { %v2666_v8 = vpop.xlane.xlu1 %2665 }
 0x4a4   : > { %3512 = vpow2.f32 %v2676_v7  ;;  %v2672_v9 = vsub.f32 %v2651_v62, %v2666_v8 }
 0x4a6   : > { %v2678_v10 = vmul.f32 1.442695, %v2672_v9 }
 0x4a7   : > { %v2669_v11 = vpop.xlane.xlu1 %2668 }
 0x4a8   : > { %3514 = vpow2.f32 %v2678_v10  ;;  %v2673_v12 = vsub.f32 %v2654_v1, %v2669_v11 }
 0x4aa   : > { %v3511_v13 = vpop.eup %3510  ;;  %v2680_v14 = vmul.f32 1.442695, %v2673_v12 }
 0x4ab   : > { %v2682_v15 = vsel %vm2657_vm9, %v3511_v13, 0.0 }
 0x4ac   : > { %3516 = vpow2.f32 %v2680_v14  ;;  %2683 = vadd.xlane.f32.xlu0 %v2682_v15 }
 0x4ae   : > { %v3513_v16 = vpop.eup %3512 }
 0x4af   : > { %v2685_v17 = vsel %vm2657_vm9, %v3513_v16, 0.0 }
 0x4b0   : > { %2686 = vadd.xlane.f32.xlu1 %v2685_v17 }
 0x4b2   : > { %v3515_v18 = vpop.eup %3514 }
 0x4b3   : > { %v2688_v22 = vsel %vm2657_vm9, %v3515_v18, 0.0 }
 0x4b4   : > { %2689 = vadd.xlane.f32.xlu0 %v2688_v22 }
 0x4b6   : > { %v3517_v31 = vpop.eup %3516 }
 0x4b7   : > { %v2691_v19 = vsel %vm2657_vm9, %v3517_v31, 0.0 }
 0x4b8   : > { %2692 = vadd.xlane.f32.xlu1 %v2691_v19 }
 0x539   : > { %v2684_v20 = vpop.xlane.xlu0 %2683 }
 0x53a   : > { %3518 = vrcp.f32 %v2684_v20 }
 0x53d   : > { %v2687_v32 = vpop.xlane.xlu1 %2686 }
 0x53e   : > { %3520 = vrcp.f32 %v2687_v32 }
 0x541   : > { %v2690_v33 = vpop.xlane.xlu0 %2689 }
 0x542   : > { %3522 = vrcp.f32 %v2690_v33 }
 0x544   : > { %v3519_v34 = vpop.eup %3518 }
 0x545   : > { %v2698_v25 = vmul.f32 %v3519_v34, %v3511_v13  ;;  %v2693_v35 = vpop.xlane.xlu1 %2692 }
 0x546   : > { %3524 = vrcp.f32 %v2693_v35 }
 0x547   : > { %2702 = vst.msk [vmem:[%s440_s12] sm:$0xff] %vm2657_vm9, %v2698_v25 }
 0x548   : > { %v3521_v21 = vpop.eup %3520 }
 0x549   : > { %v2699_v26 = vmul.f32 %v3521_v21, %v3513_v16 }
 0x54b   : > { %2703 = vst.msk [vmem:[%s440_s12 + $0x8] sm:$0xff] %vm2657_vm9, %v2699_v26 }
 0x54c   : > { %v3523_v36 = vpop.eup %3522 }
 0x54d   : > { %v2700_v27 = vmul.f32 %v3523_v36, %v3515_v18 }
 0x54f   : > { %2704 = vst.msk [vmem:[%s440_s12 + $0x10] sm:$0xff] %vm2657_vm9, %v2700_v27 }
 0x550   : > { %v3525_v24 = vpop.eup %3524 }
 0x551   : > { %v2701_v23 = vmul.f32 %v3525_v24, %v3517_v31 }
 0x553   : > { %2705 = vst.msk [vmem:[%s440_s12 + $0x18] sm:$0xff] %vm2657_vm9, %v2701_v23 }
 0x554 PF: > { %s23_s17 = sadd.s32 1, %s3596_s17  }
 0x555   : > { %p20_p7 = scmp.ge.s32.totalorder %s23_s17, 4  }
 0x557   :  { %22 = sbr.rel (!%p20_p7) target bundleno = 2 (0x2), region = 106 }
 0x55e   :  { %2728 = vsyncpa [#allocation3], 1 }
 0x55f   :  { %2730 = vsyncpa [#allocation3 + $0x1], 1 }
 0x560   :  { %2731 = vsyncpa [#allocation5], 1 }

</bundles_post_ra>
